<compile_context>
chip_gen: v7x
topology: tpu7x:2x2x1
jax: 0.10.0
libtpu: 0.0.40
codegen_flags: <defaults>
</compile_context>

<pallas_src>
import functools
import math

import jax
import jax.numpy as jnp
from jax.experimental import pallas as pl
from jax.experimental.pallas import tpu as pltpu

VMEM_LIMIT = 32 * 1024 * 1024  # explicit scoped-VMEM limit (safe on v5e/v6e/v7x)


# ----------------------------- ALiBi slopes (deterministic) -----------------------------
def _get_interleave(n):
    def _get_interleave_power_of_2(n):
        start = 2 ** (-(2 ** (-(math.log2(n) - 3))))
        ratio = start
        return [start * ratio ** i for i in range(n)]

    if math.log2(n).is_integer():
        return _get_interleave_power_of_2(n)
    closest = 2 ** math.floor(math.log2(n))
    return (_get_interleave_power_of_2(closest)
            + _get_interleave(2 * closest)[0::2][: n - closest])


def _get_alibi_slopes(total_num_heads: int) -> jnp.ndarray:
    return jnp.asarray(_get_interleave(total_num_heads), dtype=jnp.float32)


def _tile(dim, pref):
    """Pick a tile size: preferred if it divides the dim, else the whole dim."""
    return pref if dim % pref == 0 else dim


# ------------------------- fused RMSNorm + matmul (QKV projection) -------------------------
def _rms_matmul_kernel(eps, x_ref, g_ref, w_ref, o_ref):
    x = x_ref[...].astype(jnp.float32)
    var = jnp.mean(x * x, axis=-1, keepdims=True)
    xn = (x * jax.lax.rsqrt(var + eps) * g_ref[...].astype(jnp.float32)).astype(x_ref.dtype)
    o_ref[...] = jnp.dot(xn, w_ref[...],
                         preferred_element_type=jnp.float32).astype(o_ref.dtype)


def rmsnorm_matmul(x, gamma, w, eps, *, tm=128, tn=256):
    """out = RMSNorm(x; gamma) @ w.   x: [T, K], gamma: [1, K], w: [K, N] -> [T, N]."""
    T, K = x.shape
    Kw, N = w.shape
    assert K == Kw
    tm = _tile(T, tm)
    tn = _tile(N, tn)
    grid = (T // tm, N // tn)
    return pl.pallas_call(
        functools.partial(_rms_matmul_kernel, eps),
        out_shape=jax.ShapeDtypeStruct((T, N), x.dtype),
        grid_spec=pltpu.PrefetchScalarGridSpec(
            num_scalar_prefetch=0,
            grid=grid,
            in_specs=[
                pl.BlockSpec((tm, K), lambda i, j: (i, 0)),
                pl.BlockSpec((1, K), lambda i, j: (0, 0)),
                pl.BlockSpec((K, tn), lambda i, j: (0, j)),
            ],
            out_specs=pl.BlockSpec((tm, tn), lambda i, j: (i, j)),
        ),
        compiler_params=pltpu.CompilerParams(
            dimension_semantics=("parallel", "parallel"),
            vmem_limit_bytes=VMEM_LIMIT),
    )(x, gamma, w)


# ------------------- flash-style causal ALiBi attention (reads qkv directly) -------------------
def _flash_alibi_kernel(scale, tq, tk, slopes_ref, q_ref, k_ref, v_ref, o_ref,
                        m_sc, l_sc, acc_sc):
    h = pl.program_id(0)
    qi = pl.program_id(1)
    kv = pl.program_id(2)

    @pl.when(kv == 0)
    def _():
        m_sc[...] = jnp.full_like(m_sc, -jnp.inf)
        l_sc[...] = jnp.zeros_like(l_sc)
        acc_sc[...] = jnp.zeros_like(acc_sc)

    # Skip KV tiles that are entirely in the future of every query row of this Q tile.
    @pl.when(kv * tk <= qi * tq + (tq - 1))
    def _():
        slope = slopes_ref[h]
        q = q_ref[...] * scale                                   # fold 1/sqrt(D) into q
        s = jnp.dot(q, k_ref[...].T,
                    preferred_element_type=jnp.float32)          # [tq, tk] f32
        row = qi * tq + jax.lax.broadcasted_iota(jnp.int32, (tq, 1), 0)
        col = kv * tk + jax.lax.broadcasted_iota(jnp.int32, (1, tk), 1)
        s = s + slope * (col - row).astype(jnp.float32)          # ALiBi bias (rank-1 outer)
        s = jnp.where(col <= row, s, -1e30)                      # causal mask

        m_prev = m_sc[...]
        m_new = jnp.maximum(m_prev, jnp.max(s, axis=-1, keepdims=True))
        alpha = jnp.exp(m_prev - m_new)
        p = jnp.exp(s - m_new)
        l_sc[...] = alpha * l_sc[...] + jnp.sum(p, axis=-1, keepdims=True)
        acc_sc[...] = alpha * acc_sc[...] + jnp.dot(
            p.astype(v_ref.dtype), v_ref[...], preferred_element_type=jnp.float32)
        m_sc[...] = m_new

    @pl.when(kv == pl.num_programs(2) - 1)
    def _():
        o_ref[...] = (acc_sc[...] *
                      pl.reciprocal(l_sc[...], approx=True)).astype(o_ref.dtype)


def flash_alibi_attention(qkv, slopes, *, num_heads, hidden_size, scale,
                          tq=128, tk=128):
    """qkv: [T, 3H]; slopes: [num_heads] f32 -> attention output [T, H] (head-major columns)."""
    T, three_h = qkv.shape
    H = hidden_size
    assert three_h == 3 * H
    D = H // num_heads
    tq = _tile(T, tq)
    tk = _tile(T, tk)
    nh = num_heads
    grid = (nh, T // tq, T // tk)

    grid_spec = pltpu.PrefetchScalarGridSpec(
        num_scalar_prefetch=1,
        grid=grid,
        in_specs=[
            # q columns: h*D .. (h+1)*D of the [T, 3H] qkv buffer
            pl.BlockSpec((tq, D), lambda h, qi, kv, s: (qi, h)),
            # k columns: H + h*D
            pl.BlockSpec((tk, D), lambda h, qi, kv, s: (kv, nh + h)),
            # v columns: 2H + h*D
            pl.BlockSpec((tk, D), lambda h, qi, kv, s: (kv, 2 * nh + h)),
        ],
        out_specs=pl.BlockSpec((tq, D), lambda h, qi, kv, s: (qi, h)),
        scratch_shapes=[
            pltpu.VMEM((tq, 1), jnp.float32),   # running max
            pltpu.VMEM((tq, 1), jnp.float32),   # running sum
            pltpu.VMEM((tq, D), jnp.float32),   # output accumulator
        ],
    )
    return pl.pallas_call(
        functools.partial(_flash_alibi_kernel, scale, tq, tk),
        out_shape=jax.ShapeDtypeStruct((T, H), qkv.dtype),
        grid_spec=grid_spec,
        compiler_params=pltpu.CompilerParams(
            dimension_semantics=("parallel", "parallel", "arbitrary"),
            vmem_limit_bytes=VMEM_LIMIT),
    )(slopes, qkv, qkv, qkv)


# -------------------- K-tiled matmul with fused residual add (o_proj / down_proj) --------------------
def _matmul_residual_kernel(x_ref, w_ref, r_ref, o_ref, acc_ref):
    @pl.when(pl.program_id(2) == 0)
    def _():
        acc_ref[...] = jnp.zeros_like(acc_ref)

    acc_ref[...] += jnp.dot(x_ref[...], w_ref[...],
                            preferred_element_type=jnp.float32)

    @pl.when(pl.program_id(2) == pl.num_programs(2) - 1)
    def _():
        o_ref[...] = (acc_ref[...] + r_ref[...].astype(jnp.float32)).astype(o_ref.dtype)


def matmul_residual(x, w, residual, *, tm=128, tn=256, tkk=256):
    """out = x @ w + residual.   x: [M, K], w: [K, N], residual: [M, N]."""
    M, K = x.shape
    Kw, N = w.shape
    assert K == Kw and residual.shape == (M, N)
    tm = _tile(M, tm)
    tn = _tile(N, tn)
    tkk = _tile(K, tkk)
    grid = (M // tm, N // tn, K // tkk)
    return pl.pallas_call(
        _matmul_residual_kernel,
        out_shape=jax.ShapeDtypeStruct((M, N), x.dtype),
        grid_spec=pltpu.PrefetchScalarGridSpec(
            num_scalar_prefetch=0,
            grid=grid,
            in_specs=[
                pl.BlockSpec((tm, tkk), lambda i, j, k: (i, k)),
                pl.BlockSpec((tkk, tn), lambda i, j, k: (k, j)),
                pl.BlockSpec((tm, tn), lambda i, j, k: (i, j)),
            ],
            out_specs=pl.BlockSpec((tm, tn), lambda i, j, k: (i, j)),
            scratch_shapes=[pltpu.VMEM((tm, tn), jnp.float32)],
        ),
        compiler_params=pltpu.CompilerParams(
            dimension_semantics=("parallel", "parallel", "arbitrary"),
            vmem_limit_bytes=VMEM_LIMIT),
    )(x, w, residual)


# -------------------- fused RMSNorm + gate_up matmul + SiLU(gate)*up --------------------
def _rms_gateup_silu_kernel(eps, x_ref, g_ref, wg_ref, wu_ref, o_ref):
    x = x_ref[...].astype(jnp.float32)
    var = jnp.mean(x * x, axis=-1, keepdims=True)
    xn = (x * jax.lax.rsqrt(var + eps) * g_ref[...].astype(jnp.float32)).astype(x_ref.dtype)
    gate = jnp.dot(xn, wg_ref[...], preferred_element_type=jnp.float32)
    up = jnp.dot(xn, wu_ref[...], preferred_element_type=jnp.float32)
    o_ref[...] = (gate * jax.nn.sigmoid(gate) * up).astype(o_ref.dtype)


def rms_gateup_silu(x, gamma, w_gate_up, eps, *, tm=128, tn=256):
    """out = SiLU(RMSNorm(x) @ Wg) * (RMSNorm(x) @ Wu).
    x: [T, K], gamma: [1, K], w_gate_up: [K, 2I] -> [T, I]."""
    T, K = x.shape
    Kw, two_i = w_gate_up.shape
    assert K == Kw and two_i % 2 == 0
    inter = two_i // 2
    tm = _tile(T, tm)
    tn = _tile(inter, tn)
    n_j = inter // tn
    grid = (T // tm, n_j)
    return pl.pallas_call(
        functools.partial(_rms_gateup_silu_kernel, eps),
        out_shape=jax.ShapeDtypeStruct((T, inter), x.dtype),
        grid_spec=pltpu.PrefetchScalarGridSpec(
            num_scalar_prefetch=0,
            grid=grid,
            in_specs=[
                pl.BlockSpec((tm, K), lambda i, j: (i, 0)),        # x
                pl.BlockSpec((1, K), lambda i, j: (0, 0)),         # rmsnorm weight
                pl.BlockSpec((K, tn), lambda i, j: (0, j)),        # gate columns
                pl.BlockSpec((K, tn), lambda i, j: (0, n_j + j)),  # up columns
            ],
            out_specs=pl.BlockSpec((tm, tn), lambda i, j: (i, j)),
        ),
        compiler_params=pltpu.CompilerParams(
            dimension_semantics=("parallel", "parallel"),
            vmem_limit_bytes=VMEM_LIMIT),
    )(x, gamma, w_gate_up, w_gate_up)


# ----------------------------------- Layer wrapper -----------------------------------
def baichuan_layer_forward(positions, hidden_states, params, *, num_heads, eps):
    del positions  # unused for ALIBI position embedding (same as the torch module)
    T, H = hidden_states.shape
    D = H // num_heads
    scale = D ** (-0.5)

    # --- self attention (RMSNorm fused into QKV projection, residual fused into o_proj) ---
    qkv = rmsnorm_matmul(hidden_states, params["input_ln_w"], params["w_pack"], eps)  # [T, 3H]
    attn = flash_alibi_attention(qkv, params["alibi_slopes"],
                                 num_heads=num_heads, hidden_size=H, scale=scale)     # [T, H]
    hidden = matmul_residual(attn, params["o_proj"], hidden_states)                   # [T, H]

    # --- MLP (RMSNorm + SiLU*up fused into gate_up matmul, residual fused into down_proj) ---
    act = rms_gateup_silu(hidden, params["post_ln_w"], params["gate_up"], eps)        # [T, I]
    out = matmul_residual(act, params["down"], hidden)                                # [T, H]
    return out


# ------------------------------- pure-JAX reference -------------------------------
def reference_forward(hidden_states, params, *, num_heads, eps):
    def rms(x, w):
        xf = x.astype(jnp.float32)
        var = jnp.mean(xf * xf, axis=-1, keepdims=True)
        return xf * jax.lax.rsqrt(var + eps) * w

    T, H = hidden_states.shape
    D = H // num_heads
    scale = D ** (-0.5)

    residual = hidden_states
    x = rms(hidden_states, params["input_ln_w"])
    qkv = x @ params["w_pack"]
    q, k, v = jnp.split(qkv, 3, axis=-1)
    q = q.reshape(T, num_heads, D).transpose(1, 0, 2)
    k = k.reshape(T, num_heads, D).transpose(1, 0, 2)
    v = v.reshape(T, num_heads, D).transpose(1, 0, 2)
    s = jnp.einsum("hqd,hkd->hqk", q, k) * scale
    qi = jnp.arange(T)[None, :, None]
    kj = jnp.arange(T)[None, None, :]
    s = s + params["alibi_slopes"][:, None, None] * (kj - qi)
    s = jnp.where(kj <= qi, s, -1e30)
    p = jax.nn.softmax(s, axis=-1)
    attn = jnp.einsum("hqk,hkd->hqd", p, v).transpose(1, 0, 2).reshape(T, H)
    hidden = residual + attn @ params["o_proj"]

    residual = hidden
    x = rms(hidden, params["post_ln_w"])
    gu = x @ params["gate_up"]
    inter = params["down"].shape[0]
    g, u = gu[:, :inter], gu[:, inter:]
    return residual + (g * jax.nn.sigmoid(g) * u) @ params["down"]


# ---------------------------------------- main ----------------------------------------
if __name__ == "__main__":
    # small but TPU-shaped config: head_dim = 128 (lane-dense attention blocks)
    T = 256          # num_tokens (flattened batch*seq)
    H = 512          # hidden_size
    NH = 4           # num_attention_heads  -> head_dim = 128
    I = 1024         # intermediate_size
    EPS = 1e-6       # rms_norm_eps

    key = jax.random.PRNGKey(0)
    k0, k1, k2, k3, k4, k5, k6 = jax.random.split(key, 7)

    params = {
        "w_pack":      0.02 * jax.random.normal(k0, (H, 3 * H), jnp.float32),
        "o_proj":      0.02 * jax.random.normal(k1, (H, H), jnp.float32),
        "gate_up":     0.02 * jax.random.normal(k2, (H, 2 * I), jnp.float32),
        "down":        0.02 * jax.random.normal(k3, (I, H), jnp.float32),
        "input_ln_w":  (1.0 + 0.1 * jax.random.normal(k4, (1, H), jnp.float32)),
        "post_ln_w":   (1.0 + 0.1 * jax.random.normal(k5, (1, H), jnp.float32)),
        "alibi_slopes": _get_alibi_slopes(NH),
    }

    hidden_states = jax.random.normal(k6, (T, H), jnp.float32)
    positions = jnp.arange(T, dtype=jnp.int32)

    out = baichuan_layer_forward(positions, hidden_states, params,
                                 num_heads=NH, eps=EPS)
    out = jax.block_until_ready(out)

    ref = reference_forward(hidden_states, params, num_heads=NH, eps=EPS)
    assert out.shape == (T, H) and out.dtype == jnp.float32
    assert bool(jnp.all(jnp.isfinite(out)))
    assert bool(jnp.allclose(out, ref, atol=2e-2, rtol=2e-2)), "mismatch vs JAX reference"

    print("KERNEL_OK")
</pallas_src>

<mosaic_0001>
module attributes {stable_mosaic.version = 11 : i64} {
  func.func @_rms_matmul_kernel(%arg0: i32, %arg1: i32, %arg2: memref<128x512xf32, #tpu.memory_space<vmem>>, %arg3: memref<1x512xf32, #tpu.memory_space<vmem>>, %arg4: memref<512x256xf32, #tpu.memory_space<vmem>>, %arg5: memref<128x256xf32, #tpu.memory_space<vmem>>) attributes {dimension_semantics = [#tpu.dimension_semantics<parallel>, #tpu.dimension_semantics<parallel>], iteration_bounds = array<i64: 2, 6>, scalar_prefetch = 0 : i64, scratch_operands = 0 : i64, tpu.core_type = #tpu.core_type<tc>, window_params = [{transform_indices = @transform_0, window_bounds = array<i64: 128, 512>}, {pipeline_mode = #tpu.pipeline_mode<synchronous>, transform_indices = @transform_1, window_bounds = array<i64: 1, 512>}, {transform_indices = @transform_2, window_bounds = array<i64: 512, 256>}, {transform_indices = @transform_3, window_bounds = array<i64: 128, 256>}]} {
    %c0 = arith.constant 0 : index
    %c0_0 = arith.constant 0 : index
    %0 = vector.load %arg2[%c0, %c0_0] : memref<128x512xf32, #tpu.memory_space<vmem>>, vector<128x512xf32>
    %1 = arith.mulf %0, %0 : vector<128x512xf32>
    %cst = arith.constant dense<0.000000e+00> : vector<128xf32>
    %2 = vector.multi_reduction <add>, %1, %cst [1] : vector<128x512xf32> to vector<128xf32>
    %3 = vector.shape_cast %2 : vector<128xf32> to vector<128x1xf32>
    %cst_1 = arith.constant 5.120000e+02 : f32
    %4 = vector.broadcast %cst_1 : f32 to vector<128x1xf32>
    %5 = arith.divf %3, %4 : vector<128x1xf32>
    %cst_2 = arith.constant 9.99999997E-7 : f32
    %6 = vector.broadcast %cst_2 : f32 to vector<128x1xf32>
    %7 = arith.addf %5, %6 : vector<128x1xf32>
    %8 = math.rsqrt %7 : vector<128x1xf32>
    %9 = vector.broadcast %8 : vector<128x1xf32> to vector<128x512xf32>
    %10 = arith.mulf %0, %9 : vector<128x512xf32>
    %c0_3 = arith.constant 0 : index
    %c0_4 = arith.constant 0 : index
    %11 = vector.load %arg3[%c0_3, %c0_4] : memref<1x512xf32, #tpu.memory_space<vmem>>, vector<1x512xf32>
    %12 = vector.broadcast %11 : vector<1x512xf32> to vector<128x512xf32>
    %13 = arith.mulf %10, %12 : vector<128x512xf32>
    %c0_5 = arith.constant 0 : index
    %c0_6 = arith.constant 0 : index
    %14 = vector.load %arg4[%c0_5, %c0_6] : memref<512x256xf32, #tpu.memory_space<vmem>>, vector<512x256xf32>
    %cst_7 = arith.constant dense<0.000000e+00> : vector<128x256xf32>
    %15 = tpu.matmul %13, %14, %cst_7 {dimension_numbers = #tpu.dot_dimension_numbers<[1], [0], [0], [1], [0, 0, 1, 1], [], []>} : vector<128x512xf32>, vector<512x256xf32>, vector<128x256xf32> -> vector<128x256xf32>
    %c0_8 = arith.constant 0 : index
    %c0_9 = arith.constant 0 : index
    %16 = vector.load %arg5[%c0_8, %c0_9] : memref<128x256xf32, #tpu.memory_space<vmem>>, vector<128x256xf32>
    tpu.vector_store %arg5[%c0_8, %c0_9], %15 {strides = array<i32>} : memref<128x256xf32, #tpu.memory_space<vmem>>, vector<128x256xf32>,
    return
  }
  func.func @transform_0(%arg0: i32, %arg1: i32) -> (i32, i32) {
    %c0_i32 = arith.constant 0 : i32
    %c0_i32_0 = arith.constant 0 : i32
    return %arg0, %c0_i32 : i32, i32
  }
  func.func @transform_1(%arg0: i32, %arg1: i32) -> (i32, i32) {
    %c0_i32 = arith.constant 0 : i32
    %c0_i32_0 = arith.constant 0 : i32
    %c0_i32_1 = arith.constant 0 : i32
    return %c0_i32, %c0_i32_0 : i32, i32
  }
  func.func @transform_2(%arg0: i32, %arg1: i32) -> (i32, i32) {
    %c0_i32 = arith.constant 0 : i32
    %c0_i32_0 = arith.constant 0 : i32
    return %c0_i32, %arg1 : i32, i32
  }
  func.func @transform_3(%arg0: i32, %arg1: i32) -> (i32, i32) {
    %c0_i32 = arith.constant 0 : i32
    return %arg0, %arg1 : i32, i32
  }
}

</mosaic_0001>

<bundles_post_ra>
// kernel: tpu_custom_call.1
= control target key start
LH: loop header
LB: loop body
LE: loop exit
PB: predicated region body
PF: predicated region fallthrough
CT: control target
= control target key end

     0   :  { %s2801_s0 = inlined_call_operand.hbm [shape: f32[256,512], index: 0, kind: input, shape index: {}]   ;;  %s2802_s1 = inlined_call_operand.hbm [shape: f32[1,512], index: 1, kind: input, shape index: {}]   ;;  %s2803_s2 = inlined_call_operand.hbm [shape: f32[512,1536], index: 2, kind: input, shape index: {}]   ;;  %s2804_s3 = inlined_call_operand.hbm [shape: f32[256,1536], index: 3, kind: output, shape index: {}]  }
   0x1   :  { %2820 = sst [smem:[#allocation24_spill]] %s2801_s0 }
   0x2   :  { %2821 = sst [smem:[#allocation25_spill]] %s2804_s3 }
   0x3   :  { %8 = vsyncpa [#allocation3], 0 }
   0x4   :  { %10 = vsyncpa [#allocation3 + $0x1], 0 }
   0x5   :  { %11 = vsyncpa [#allocation6], 0 }
   0x6   :  { %12 = vsyncpa [#allocation4], 0 }
   0x7   :  { %14 = vsyncpa [#allocation4 + $0x1], 0  ;;  %s1971_s12 = smov 0   ;;  %s1973_s13 = smov 0  }
   0x8   :  { %s1975_s14 = smov 0   ;;  %s1977_s15 = smov 0  }
   0x9   :  { %s1979_s16 = smov 0   ;;  %s1981_s17 = smov 0  }
   0xa   :  { %s1983_s18 = smov 0   ;;  %s1985_s19 = smov 0  }
   0xb   :  { %s1987_s20 = smov 0   ;;  %s1989_s21 = smov 0  }
   0xc   :  { %s1991_s22 = smov 0   ;;  %s1993_s23 = smov 0  }
   0xd   :  { %s1995_s24 = smov 0   ;;  %s1997_s25 = smov 0  }
   0xe LB: > { %2822 = sst [smem:[#allocation13_spill]] %s1905_s17  ;;  %s29_s26 = sadd.s32 1, %s1929_s23  ;;  %s1937_s25 = sphi %s1997_s25, %s20_s25   ;;  %s1933_s24 = sphi %s1995_s24, %s2881_s24   ;;  %s1929_s23 = sphi %s1993_s23, %s2880_s23   ;;  %s1925_s22 = sphi %s1991_s22, %s2867_s22   ;;  %s1921_s21 = sphi %s1989_s21, %s2866_s21   ;;  %s1917_s20 = sphi %s1987_s20, %s2879_s20   ;;  %s1913_s19 = sphi %s1985_s19, %s2878_s19   ;;  %s1909_s18 = sphi %s1983_s18, %s2877_s18   ;;  %s1905_s17 = sphi %s1981_s17, %s2876_s17   ;;  %s1901_s16 = sphi %s1979_s16, %s2875_s16   ;;  %s1897_s15 = sphi %s1977_s15, %s2874_s15   ;;  %s1893_s14 = sphi %s1975_s14, %s2873_s14   ;;  %s1889_s13 = sphi %s1973_s13, %s2872_s13   ;;  %s1885_s12 = sphi %s1971_s12, %s2871_s12  }
   0xf   : > { %2823 = sst [smem:[#allocation14_spill]] %s1917_s20  ;;  %s32_s27 = sadd.s32 1, %s1933_s24 }
  0x10   : > { %2824 = sst [smem:[#allocation15_spill]] %s1921_s21  ;;  %p30_p0 = scmp.ge.s32.totalorder %s29_s26, 6 }
  0x11   : > { %2825 = sst [smem:[#allocation16_spill]] %s1925_s22  ;;  %s39_s28 = sadd.s32 1, %s1917_s20 }
  0x12   : > { %2826 = sst [smem:[#allocation17_spill]] %s1929_s23  ;;  %p46_p1 = scmp.ne.s32.totalorder %s1917_s20, %s1913_s19 }
  0x13   : > { %2827 = sst [smem:[#allocation18_spill]] %s1933_s24  ;;  %p2809_p2 = scmp.eq.s32.totalorder %s1937_s25, 0 }
  0x14   : > { %s2883_s26 = smov (%p30_p0, %s29_s26), 0  ;;  %s2885_s27 = smov (!%p30_p0, %s32_s27), %s1933_s24 }
  0x15   : > { %2828 = sst [smem:[#allocation19_spill]] %s2883_s26  ;;  %p2052_p3 = por %p2809_p2, %p46_p1 }
  0x16   : > { %s2058_s30 = ssub.s32 %s1929_s23, %s2883_s26  ;;  %p34_p4 = scmp.ge.s32.totalorder %s2885_s27, 2 }
  0x17   : > { %p2808_p6 = scmp.lt.s32.totalorder %s1937_s25, 12  ;;  %s162_s4 = sand.u32 1, %s1937_s25  }
  0x18   : > { %s2887_s27 = smov (%p34_p4, %s2885_s27), 0  ;;  %s164_s5 = sand.u32 1, %s1917_s20  }
  0x19   : > { %2830 = sst [smem:[#allocation20_spill]] %s2887_s27  ;;  %s36_s6 = ssub.s32 %s1933_s24, %s2887_s27 }
  0x1a   : > { %p37_p7 = scmp.eq.s32.totalorder %s36_s6, 0  ;;  %s111_s7 = sor.u32 %s2058_s30, %s36_s6 }
  0x1b   : > { %p2069_p8 = scmp.eq.s32.totalorder %s111_s7, 0  ;;  %s1286_s9 = sshll.u32 %s164_s5, 9 }
  0x1c   : > { %s2074_s10 = scalar_select %p37_p7, %s1917_s20, %s39_s28  }
  0x1d   : > { %s1306_s11 = sshll.u32 %s1933_s24, 13  ;;  %s2833_s0 = sld [smem:[#allocation24_spill]] }
  0x1e   : > { %2832 = sst [smem:[#allocation21_spill]] %s2074_s10  ;;  %s166_s27 = scalar_lea.vmem [#allocation2], %s1286_s9 }
  0x1f   : > { %s174_s22 = sshll.u32 %s166_s27, 4  ;;  %p2088_p9 = pnand %p2808_p6, %p2052_p3  ;;  %s2082_s22 = int_to_ptr.vmem [resolvable:$true] %s174_s22 }
  0x20   : > { %s2092_s28 = scalar_lea.sflag [#allocation3], %s162_s4 }
  0x21   : > { %p1697_p11 = pneg %p2088_p9 }
  0x23   : > { %s2080_s21 = scalar_lea.hbm %s2833_s0, %s1306_s11  ;;  %s1700_s29 = scalar_lea.hbm %s2833_s0, 16384 }
  0x24   : > { %s1695_s3 = scalar_lea.hbm %s2080_s21, 8192  ;;  %p1701_p0 = scmp.lt.u32.totalorder %s2080_s21, %s2833_s0 }
  0x25   : > { %p1696_p10 = scmp.ne.s32.totalorder %s2080_s21, %s1695_s3  ;;  %p1702_p1 = scmp.lt.u32.totalorder %s1700_s29, %s1695_s3 }
  0x26   : > { %p1704_p4 = scmp.lt.u32.totalorder %s1695_s3, %s2080_s21 }
  0x27   : > { %p1698_p12 = pnand %p1697_p11, %p1696_p10  ;;  %p1703_p3 = por %p1702_p1, %p1701_p0 }
  0x29   : > { %p1699_p13 = pneg %p1698_p12  ;;  %p1705_p7 = por %p1704_p4, %p1703_p3 }
  0x2b   : > { %p1706_p6 = pnand %p1705_p7, %p1699_p13 }
  0x2d   : > { %1709 = shalt.err (!%p1706_p6)
}
  0x2e   : > { %s1710_s4 = scalar_lea.vmem %s2082_s22, 8192  ;;  %s1939_s9 = smov [#allocation2]  }
  0x2f   : > { %p1711_p10 = scmp.ne.s32.totalorder %s2082_s22, %s1710_s4  ;;  %s1715_s11 = sshll.u32 %s1939_s9, 4  ;;  %s1716_s11 = int_to_ptr.vmem [resolvable:$false] %s1715_s11 }
  0x30   : > { %s1717_s26 = scalar_lea.vmem %s1716_s11, 16384  ;;  %p1718_p5 = scmp.lt.s32.totalorder %s2082_s22, %s1716_s11 }
  0x31   : > { %p1713_p12 = pnand %p1711_p10, %p1697_p11  ;;  %p1719_p0 = scmp.lt.s32.totalorder %s1717_s26, %s1710_s4 }
  0x33   : > { %p1714_p2 = pneg %p1713_p12  ;;  %p1720_p1 = por %p1719_p0, %p1718_p5 }
  0x35   : > { %p1721_p3 = pnand %p1720_p1, %p1714_p2 }
  0x37   : > { %1724 = shalt.err (!%p1721_p3)
}
  0x38   : > { %s1940_s3 = smov 512   ;;  %s1941_s27 = smov 32  }
  0x39   : > { %1486 = dma.hbm_to_vmem [thread:$0]  (!%p2088_p9), %s2080_s21, 8192, %s2082_s22, %s2092_s28, %s1940_s3, %s1940_s3, %s1941_s27  }
  0x3a   : > { %s2121_s29 = sadd.s32 4294967295, %s1937_s25   ;;  %s1282_s6 = sadd.s32 4294967294, %s1937_s25  }
  0x3b   : > { %p52_p2 = scmp.ne.s32.totalorder %s1913_s19, %s1909_s18  ;;  %p2814_p5 = scmp.eq.s32.totalorder %s2121_s29, 0 }
  0x3c   : > { %s86_s7 = sadd.s32 1, %s1905_s17  ;;  %p2835_p6 = scmp.eq.s32.totalorder %s2058_s30, 0 }
  0x3d   : > { %p2135_p11 = por %p2814_p5, %p52_p2  ;;  %p93_p9 = scmp.ne.s32.totalorder %s1905_s17, %s1901_s16 }
  0x3e   : > { %s2131_s4 = scalar_select %p2835_p6, %s1905_s17, %s86_s7  }
  0x3f   : > { %s2837_s21 = scalar_select %p2135_p11, 1, 0 }
  0x40   : > { %2836 = sst [smem:[#allocation22_spill]] %s2131_s4  ;;  %p99_p13 = scmp.ne.s32.totalorder %s1901_s16, %s1897_s15 }
  0x41   : > { %s114_s22 = sadd.s32 1, %s1893_s14  ;;  %p2838_p4 = scmp.eq.s32.totalorder %s1937_s25, 0 }
  0x42   : > { %p124_p10 = scmp.ne.s32.totalorder %s1893_s14, %s1889_s13  ;;  %p2154_p12 = por %p99_p13, %p2814_p5 }
  0x43   : > { %p2146_p7 = por %p93_p9, %p2838_p4  ;;  %p125_p0 = scmp.eq.s32.totalorder %s2121_s29, 11 }
  0x44   : > { %s2840_s18 = scalar_select %p2154_p12, 1, 0 }
  0x45   : > { %s2162_s30 = scalar_select %p2069_p8, %s1893_s14, %s114_s22  }
  0x46   : > { %p2164_p1 = por %p125_p0, %p124_p10  ;;  %p130_p3 = scmp.ne.s32.totalorder %s1889_s13, %s1885_s12 }
  0x47   : > { %2841 = sst [smem:[#allocation23_spill]] %s2162_s30  ;;  %p131_p2 = scmp.eq.s32.totalorder %s1282_s6, 11 }
  0x48   : > { %s2842_s15 = scalar_select %p2164_p1, 1, 0 }
  0x49   : > { %p1283_p6 = scmp.ge.s32.totalorder %s1937_s25, 1  ;;  %p138_p9 = scmp.lt.s32.totalorder %s1937_s25, 13 }
  0x4a   : > { %p2172_p4 = por %p131_p2, %p130_p3  ;;  %s1942_s8 = smov [#allocation5]  }
  0x4b   : > { %p2176_p13 = pnand %p1283_p6, %p138_p9  ;;  %s151_s26 = sshll.u32 %s1942_s8, 4  ;;  %s152_s26 = int_to_ptr.vmem [resolvable:$true] %s151_s26 }
  0x4c   : > { %s2843_s9 = scalar_select %p2172_p4, 1, 0 }
  0x4d   : > { %s2844_s11 = scalar_select %p2176_p13, 1, 0 }
  0x4e   : > { %p2845_p8 = scmp.lt.s32.totalorder %s1937_s25, 12  ;;  %p1479_p0 = pneg %p2176_p13 }
  0x4f   : > { %s186_s27 = sand.u32 1, %s1905_s17   ;;  %s1307_s22 = sshll.u32 %s1929_s23, 8 }
  0x50   : > { %p2184_p10 = pnand %p2845_p8, %p2146_p7  ;;  %s1290_s6 = sshll.u32 %s186_s27, 10 }
  0x51   : > { %p2193_p3 = pnand %p1479_p0, %p2814_p5  ;;  %s188_s0 = scalar_lea.vmem [#allocation7], %s1290_s6 }
  0x52   : > { %s2846_s3 = scalar_select %p2184_p10, 1, 0 }
  0x53   : > { %s195_s8 = sshll.u32 %s188_s0, 4  ;;  %s2201_s10 = scalar_lea.hbm %s2803_s2, %s1307_s22  ;;  %s2219_s8 = int_to_ptr.vmem [resolvable:$true] %s195_s8 }
  0x54   : > { %s1725_s30 = scalar_lea.hbm %s2802_s1, 64  ;;  %p1727_p2 = pneg %p2193_p3 }
  0x55   : > { %p1726_p7 = scmp.ne.s32.totalorder %s2802_s1, %s1725_s30  ;;  %p1732_p8 = scmp.lt.u32.totalorder %s1725_s30, %s2802_s1 }
  0x57   : > { %p1728_p6 = pnand %p1727_p2, %p1726_p7 }
  0x59   : > { %p1729_p9 = pneg %p1728_p6 }
  0x5b   : > { %p1734_p0 = pnand %p1732_p8, %p1729_p9 }
  0x5d   : > { %1737 = shalt.err (!%p1734_p0)
}
  0x5e   : > { %s1738_s0 = scalar_lea.vmem %s152_s26, 64  ;;  %p1746_p12 = scmp.lt.s32.totalorder %s152_s26, %s152_s26 }
  0x5f   : > { %p1739_p5 = scmp.ne.s32.totalorder %s152_s26, %s1738_s0  ;;  %p1747_p11 = scmp.lt.s32.totalorder %s1738_s0, %s1738_s0 }
  0x61   : > { %p1741_p4 = pnand %p1739_p5, %p1727_p2  ;;  %p1748_p13 = por %p1747_p11, %p1746_p12 }
  0x63   : > { %p1742_p1 = pneg %p1741_p4 }
  0x65   : > { %p1749_p10 = pnand %p1748_p13, %p1742_p1 }
  0x67   : > { %1752 = shalt.err (!%p1749_p10)
}
  0x68   : > { %1482 = dma.hbm_to_vmem [thread:$0]  (!%p2193_p3), %s2802_s1, 64, %s152_s26, [#allocation6]  }
  0x69   : > { %s1753_s23 = scalar_lea.hbm %s2201_s10, 16384  ;;  %p2848_p4 = scmp.ne.s32.totalorder %s2846_s3, 0 }
  0x6a   : > { %p1754_p5 = scmp.ne.s32.totalorder %s2201_s10, %s1753_s23  ;;  %s1758_s30 = scalar_lea.hbm %s2803_s2, 98304 }
  0x6b   : > { %p1755_p11 = pneg %p2848_p4  ;;  %p1759_p13 = scmp.lt.u32.totalorder %s2201_s10, %s2803_s2 }
  0x6c   : > { %p1760_p10 = scmp.lt.u32.totalorder %s1758_s30, %s1753_s23  ;;  %p1762_p7 = scmp.lt.u32.totalorder %s1753_s23, %s2201_s10 }
  0x6d   : > { %p1756_p12 = pnand %p1755_p11, %p1754_p5 }
  0x6e   : > { %p1761_p3 = por %p1760_p10, %p1759_p13 }
  0x6f   : > { %p1757_p1 = pneg %p1756_p12 }
  0x70   : > { %p1763_p2 = por %p1762_p7, %p1761_p3 }
  0x72   : > { %p1764_p6 = pnand %p1763_p2, %p1757_p1 }
  0x74   : > { %1767 = shalt.err (!%p1764_p6)
}
  0x75   : > { %s1768_s26 = scalar_lea.vmem %s2219_s8, 16384  ;;  %s1943_s5 = smov [#allocation7]  }
  0x76   : > { %p1769_p9 = scmp.ne.s32.totalorder %s2219_s8, %s1768_s26  ;;  %s1773_s27 = sshll.u32 %s1943_s5, 4  ;;  %s1774_s27 = int_to_ptr.vmem [resolvable:$false] %s1773_s27 }
  0x77   : > { %s1775_s6 = scalar_lea.vmem %s1774_s27, 32768  ;;  %p1776_p5 = scmp.lt.s32.totalorder %s2219_s8, %s1774_s27 }
  0x78   : > { %p1771_p8 = pnand %p1769_p9, %p1755_p11  ;;  %p1777_p12 = scmp.lt.s32.totalorder %s1775_s6, %s1768_s26 }
  0x7a   : > { %p1772_p0 = pneg %p1771_p8  ;;  %p1778_p13 = por %p1777_p12, %p1776_p5 }
  0x7c   : > { %p1779_p10 = pnand %p1778_p13, %p1772_p0 }
  0x7e   : > { %1782 = shalt.err (!%p1779_p10)
}
  0x7f   : > { %s1944_s0 = smov 1536   ;;  %s1945_s17 = smov 256  }
  0x80   : > { %s1946_s20 = smov 16   ;;  %p2849_p11 = scmp.ne.s32.totalorder %s2844_s11, 0 }
  0x81   : > { %1489 = dma.hbm_to_vmem [thread:$0]  (!%p2848_p4), %s2201_s10, 16384, %s2219_s8, %s2092_s28, %s1944_s0, %s1945_s17, %s1946_s20  }
  0x82   : > { %207 = sbr.rel (%p2849_p11) target bundleno = 607 (0x25f), region = 32  ;;  %s209_s23 = sand.u32 (!%p2849_p11), 1, %s2121_s29  }
  0x83   : > { %s211_s24 = sand.u32 (!%p2849_p11), 1, %s1913_s19   ;;  %s210_s30 = scalar_lea.sflag (!%p2849_p11), [#allocation3], %s209_s23 }
  0x84   : > { %s1294_s4 = sshll.u32 (!%p2849_p11), %s211_s24, 9  ;;  %p2850_p1 = scmp.ne.s32.totalorder (!%p2849_p11), %s2837_s21, 0 }
  0x85   : > { %s2251_s7 = scalar_lea.vmem (!%p2849_p11), [#allocation2], %s1294_s4 }
  0x89   : > { %1868 = dma.done.wait (%p2850_p1), %s210_s30, 8192  }
  0x8a   : > { %1870 = vsyncadd (%p2850_p1), %s210_s30, 4294959104  ;;  %p2851_p3 = scmp.eq.s32.totalorder %s2121_s29, 0 }
  0x8c   : > { %1872 = dma.done.wait (%p2851_p3), [#allocation6], 64   ;;  %p2852_p4 = pmov %p2851_p3 }
  0x8d   : > { %s224_s10 = sand.u32 1, %s1901_s16   ;;  %p2853_p7 = scmp.ne.s32.totalorder %s2840_s18, 0 }
  0x8e   : > { %1874 = vsyncadd (%p2852_p4), [#allocation6], 4294967232  ;;  %s1296_s28 = sshll.u32 %s224_s10, 10 }
  0x8f   : > { %s2262_s11 = scalar_lea.vmem [#allocation7], %s1296_s28 }
  0x90   : > { %1876 = dma.done.wait (%p2853_p7), %s210_s30, 16384  }
  0x91   : > { %1878 = vsyncadd (%p2853_p7), %s210_s30, 4294950912  ;;  %v2269_v0 = vld [vmem:[%s2251_s7] sm:$0xff]  ;;  %v2272_v1 = vld [vmem:[%s2251_s7 + $0x8] sm:$0xff]  ;;  %s251_s29 = sand.u32 1, %s1889_s13   ;;  %s2854_s3 = sld [smem:[#allocation16_spill]] }
  0x92   : > { %v2275_v2 = vld [vmem:[%s2251_s7 + $0x10] sm:$0xff]  ;;  %v2278_v3 = vld [vmem:[%s2251_s7 + $0x18] sm:$0xff]  ;;  %v322_v4 = vmul.f32 %v2269_v0, %v2269_v0  ;;  %v323_v5 = vmul.f32 %v2272_v1, %v2272_v1  ;;  %v2287_v7 = vld [vmem:[%s2251_s7 + $0x20] sm:$0xff]  ;;  %s1297_s21 = sshll.u32 %s251_s29, 8  ;;  %s2855_s8 = sld [smem:[#allocation15_spill]] }
  0x93   : > { %v324_v6 = vmul.f32 %v2275_v2, %v2275_v2  ;;  %v2290_v8 = vld [vmem:[%s2251_s7 + $0x28] sm:$0xff]  ;;  %v325_v9 = vmul.f32 %v2278_v3, %v2278_v3  ;;  %v2295_v10 = vld [vmem:[%s2251_s7 + $0x30] sm:$0xff]  ;;  %v2298_v11 = vld [vmem:[%s2251_s7 + $0x38] sm:$0xff]  ;;  %v326_v12 = vmul.f32 %v2287_v7, %v2287_v7  ;;  %s2679_s18 = scalar_lea.vmem [#allocation8], %s1297_s21  ;;  %s2856_s20 = sld [smem:[#allocation25_spill]] }
  0x94   : > { %v327_v13 = vmul.f32 %v2290_v8, %v2290_v8  ;;  %v2305_v14 = vld [vmem:[%s2251_s7 + $0x40] sm:$0xff]  ;;  %v386_v15 = vadd.f32 %v323_v5, %v322_v4  ;;  %v328_v16 = vmul.f32 %v2295_v10, %v2295_v10  ;;  %v329_v17 = vmul.f32 %v2298_v11, %v2298_v11  ;;  %v2312_v18 = vld [vmem:[%s2251_s7 + $0x48] sm:$0xff]  ;;  %v2315_v19 = vld [vmem:[%s2251_s7 + $0x50] sm:$0xff]  ;;  %s1164_s6 = sshll.u32 %s2679_s18, 4  ;;  %s2725_s24 = scalar_lea.sflag [#allocation4], %s251_s29  ;;  %s2719_s6 = int_to_ptr.vmem [resolvable:$true] %s1164_s6 }
  0x95   : > { %v2318_v20 = vld [vmem:[%s2251_s7 + $0x58] sm:$0xff]  ;;  %v330_v21 = vmul.f32 %v2305_v14, %v2305_v14  ;;  %v331_v23 = vmul.f32 %v2312_v18, %v2312_v18  ;;  %v332_v24 = vmul.f32 %v2315_v19, %v2315_v19  ;;  %v2329_v26 = vld [vmem:[%s2251_s7 + $0x60] sm:$0xff]  ;;  %v2332_v27 = vld [vmem:[%s2251_s7 + $0x68] sm:$0xff]  ;;  %s1783_s30 = scalar_lea.vmem %s2719_s6, 4096  ;;  %p2858_p6 = scmp.ne.s32.totalorder %s2842_s15, 0 }
  0x96   : > { %v391_v22 = vadd.f32 %v327_v13, %v326_v12  ;;  %v333_v25 = vmul.f32 %v2318_v20, %v2318_v20  ;;  %v2335_v28 = vld [vmem:[%s2251_s7 + $0x70] sm:$0xff]  ;;  %v387_v29 = vadd.f32 %v386_v15, %v324_v6  ;;  %v2338_v30 = vld [vmem:[%s2251_s7 + $0x78] sm:$0xff]  ;;  %v334_v31 = vmul.f32 %v2329_v26, %v2329_v26  ;;  %v274_v34 = vld [vmem:[%s2251_s7 + $0x80] sm:$0xff]  ;;  %p1784_p2 = scmp.ne.s32.totalorder %s2719_s6, %s1783_s30 }
  0x97   : > { %v335_v32 = vmul.f32 %v2332_v27, %v2332_v27  ;;  %v336_v33 = vmul.f32 %v2335_v28, %v2335_v28  ;;  %v2348_v35 = vld [vmem:[%s2251_s7 + $0x88] sm:$0xff]  ;;  %v396_v37 = vadd.f32 %v331_v23, %v330_v21  ;;  %v337_v38 = vmul.f32 %v2338_v30, %v2338_v30  ;;  %v276_v39 = vld [vmem:[%s2251_s7 + $0x90] sm:$0xff]  ;;  %v2354_v40 = vld [vmem:[%s2251_s7 + $0x98] sm:$0xff]  ;;  %s1468_s22 = smul.u32 192, %s2854_s3 }
  0x98   : > { %v392_v36 = vadd.f32 %v391_v22, %v328_v16  ;;  %v338_v41 = vmul.f32 %v274_v34, %v274_v34  ;;  %v278_v42 = vld [vmem:[%s2251_s7 + $0xa0] sm:$0xff]  ;;  %v388_v43 = vadd.f32 %v387_v29, %v325_v9  ;;  %v339_v45 = vmul.f32 %v2348_v35, %v2348_v35  ;;  %v2360_v47 = vld [vmem:[%s2251_s7 + $0xa8] sm:$0xff]  ;;  %v280_v48 = vld [vmem:[%s2251_s7 + $0xb0] sm:$0xff]  ;;  %s1300_s26 = sshll.u32 %s2855_s8, 1  ;;  %p1785_p9 = pnand %p1784_p2, %p2858_p6 }
  0x99   : > { %v401_v44 = vadd.f32 %v335_v32, %v334_v31  ;;  %v340_v46 = vmul.f32 %v276_v39, %v276_v39  ;;  %v2364_v49 = vld [vmem:[%s2251_s7 + $0xb8] sm:$0xff]  ;;  %v397_v51 = vadd.f32 %v396_v37, %v332_v24  ;;  %v341_v52 = vmul.f32 %v2354_v40, %v2354_v40  ;;  %v282_v54 = vld [vmem:[%s2251_s7 + $0xc0] sm:$0xff]  ;;  %v283_v55 = vld [vmem:[%s2251_s7 + $0xc8] sm:$0xff]  ;;  %s1161_s5 = sadd.s32 %s1468_s22, %s1300_s26  ;;  %s2857_s4 = smov %s2856_s20 }
  0x9a   : > { %v393_v50 = vadd.f32 %v392_v36, %v329_v17  ;;  %v342_v53 = vmul.f32 %v278_v42, %v278_v42  ;;  %v284_v56 = vld [vmem:[%s2251_s7 + $0xd0] sm:$0xff]  ;;  %389 = vadd.xlane.f32.xlu0 %v388_v43  ;;  %v406_v58 = vadd.f32 %v339_v45, %v338_v41  ;;  %v343_v59 = vmul.f32 %v2360_v47, %v2360_v47  ;;  %v286_v61 = vld [vmem:[%s2251_s7 + $0xe0] sm:$0xff]  ;;  %v287_v62 = vld [vmem:[%s2251_s7 + $0xe8] sm:$0xff]  ;;  %s1302_s27 = sshll.u32 %s1161_s5, 7  ;;  %p1786_p8 = pneg %p1785_p9 }
  0x9b   : > { %v402_v57 = vadd.f32 %v401_v44, %v336_v33  ;;  %v344_v60 = vmul.f32 %v280_v48, %v280_v48  ;;  %v398_v63 = vadd.f32 %v397_v51, %v333_v25  ;;  %v285_v4 = vld [vmem:[%s2251_s7 + $0xd8] sm:$0xff]  ;;  %v346_v5 = vmul.f32 %v282_v54, %v282_v54  ;;  %v288_v9 = vld [vmem:[%s2251_s7 + $0xf0] sm:$0xff]  ;;  %v290_v17 = vld [vmem:[%s2251_s7 + $0x100] sm:$0xff]  ;;  %s2717_s23 = scalar_lea.hbm %s2856_s20, %s1302_s27 }
  0x9c   : > { %v347_v6 = vmul.f32 %v283_v55, %v283_v55  ;;  %v407_v12 = vadd.f32 %v406_v58, %v340_v46  ;;  %v345_v13 = vmul.f32 %v2364_v49, %v2364_v49  ;;  %v411_v15 = vadd.f32 %v343_v59, %v342_v53  ;;  %v291_v21 = vld [vmem:[%s2251_s7 + $0x108] sm:$0xff]  ;;  %v289_v24 = vld [vmem:[%s2251_s7 + $0xf8] sm:$0xff]  ;;  %v292_v31 = vld [vmem:[%s2251_s7 + $0x110] sm:$0xff] }
  0x9d   : > { %v348_v16 = vmul.f32 %v284_v56, %v284_v56  ;;  %399 = vadd.xlane.f32.xlu1 %v398_v63  ;;  %v403_v22 = vadd.f32 %v402_v57, %v337_v38  ;;  %v350_v25 = vmul.f32 %v286_v61, %v286_v61  ;;  %v351_v29 = vmul.f32 %v287_v62, %v287_v62  ;;  %v294_v32 = vld [vmem:[%s2251_s7 + $0x120] sm:$0xff]  ;;  %v293_v39 = vld [vmem:[%s2251_s7 + $0x118] sm:$0xff]  ;;  %v295_v41 = vld [vmem:[%s2251_s7 + $0x128] sm:$0xff] }
  0x9e   : > { %v416_v23 = vadd.f32 %v347_v6, %v346_v5  ;;  %394 = vadd.xlane.f32.xlu0 %v393_v50  ;;  %v408_v33 = vadd.f32 %v407_v12, %v341_v52  ;;  %v412_v34 = vadd.f32 %v411_v15, %v344_v60  ;;  %v349_v36 = vmul.f32 %v285_v4, %v285_v4  ;;  %v296_v45 = vld [vmem:[%s2251_s7 + $0x130] sm:$0xff]  ;;  %v298_v46 = vld [vmem:[%s2251_s7 + $0x140] sm:$0xff]  ;;  %v299_v48 = vld [vmem:[%s2251_s7 + $0x148] sm:$0xff] }
  0x9f   : > { %v352_v37 = vmul.f32 %v288_v9, %v288_v9  ;;  %v421_v38 = vadd.f32 %v351_v29, %v350_v25  ;;  %v354_v43 = vmul.f32 %v290_v17, %v290_v17  ;;  %v355_v44 = vmul.f32 %v291_v21, %v291_v21  ;;  %v297_v53 = vld [vmem:[%s2251_s7 + $0x138] sm:$0xff]  ;;  %v300_v55 = vld [vmem:[%s2251_s7 + $0x150] sm:$0xff]  ;;  %v302_v60 = vld [vmem:[%s2251_s7 + $0x160] sm:$0xff] }
  0xa0   : > { %v417_v42 = vadd.f32 %v416_v23, %v348_v16  ;;  %v413_v51 = vadd.f32 %v412_v34, %v345_v13  ;;  %v353_v50 = vmul.f32 %v289_v24, %v289_v24  ;;  %v356_v52 = vmul.f32 %v292_v31, %v292_v31  ;;  %v303_v61 = vld [vmem:[%s2251_s7 + $0x168] sm:$0xff]  ;;  %v301_v4 = vld [vmem:[%s2251_s7 + $0x158] sm:$0xff]  ;;  %v304_v9 = vld [vmem:[%s2251_s7 + $0x170] sm:$0xff] }
  0xa1   : > { %v358_v54 = vmul.f32 %v294_v32, %v294_v32  ;;  %404 = vadd.xlane.f32.xlu1 %v403_v22  ;;  %v422_v56 = vadd.f32 %v421_v38, %v352_v37  ;;  %v357_v57 = vmul.f32 %v293_v39, %v293_v39  ;;  %v426_v58 = vadd.f32 %v355_v44, %v354_v43  ;;  %v306_v17 = vld [vmem:[%s2251_s7 + $0x180] sm:$0xff]  ;;  %v307_v21 = vld [vmem:[%s2251_s7 + $0x188] sm:$0xff]  ;;  %v305_v24 = vld [vmem:[%s2251_s7 + $0x178] sm:$0xff] }
  0xa2   : > { %v359_v59 = vmul.f32 %v295_v41, %v295_v41  ;;  %409 = vadd.xlane.f32.xlu0 %v408_v33  ;;  %v418_v62 = vadd.f32 %v417_v42, %v349_v36  ;;  %v360_v63 = vmul.f32 %v296_v45, %v296_v45  ;;  %v362_v5 = vmul.f32 %v298_v46, %v298_v46  ;;  %v308_v31 = vld [vmem:[%s2251_s7 + $0x190] sm:$0xff]  ;;  %v310_v32 = vld [vmem:[%s2251_s7 + $0x1a0] sm:$0xff]  ;;  %v309_v39 = vld [vmem:[%s2251_s7 + $0x198] sm:$0xff] }
  0xa3   : > { %v363_v6 = vmul.f32 %v299_v48, %v299_v48  ;;  %v427_v12 = vadd.f32 %v426_v58, %v356_v52  ;;  %v361_v13 = vmul.f32 %v297_v53, %v297_v53  ;;  %v364_v16 = vmul.f32 %v300_v55, %v300_v55  ;;  %v311_v41 = vld [vmem:[%s2251_s7 + $0x1a8] sm:$0xff]  ;;  %v312_v42 = vld [vmem:[%s2251_s7 + $0x1b0] sm:$0xff]  ;;  %v313_v46 = vld [vmem:[%s2251_s7 + $0x1b8] sm:$0xff] }
  0xa4   : > { %v431_v15 = vadd.f32 %v359_v59, %v358_v54  ;;  %v423_v22 = vadd.f32 %v422_v56, %v353_v50  ;;  %v366_v25 = vmul.f32 %v302_v60, %v302_v60  ;;  %v367_v29 = vmul.f32 %v303_v61, %v303_v61  ;;  %v314_v48 = vld [vmem:[%s2251_s7 + $0x1c0] sm:$0xff]  ;;  %v316_v54 = vld [vmem:[%s2251_s7 + $0x1d0] sm:$0xff]  ;;  %v317_v55 = vld [vmem:[%s2251_s7 + $0x1d8] sm:$0xff] }
  0xa5   : > { %v436_v23 = vadd.f32 %v363_v6, %v362_v5  ;;  %414 = vadd.xlane.f32.xlu1 %v413_v51  ;;  %v428_v33 = vadd.f32 %v427_v12, %v357_v57  ;;  %v365_v36 = vmul.f32 %v301_v4, %v301_v4  ;;  %v368_v37 = vmul.f32 %v304_v9, %v304_v9  ;;  %v315_v51 = vld [vmem:[%s2251_s7 + $0x1c8] sm:$0xff]  ;;  %v318_v56 = vld [vmem:[%s2251_s7 + $0x1e0] sm:$0xff] }
  0xa6   : > { %v432_v34 = vadd.f32 %v431_v15, %v360_v63  ;;  %419 = vadd.xlane.f32.xlu0 %v418_v62  ;;  %v441_v43 = vadd.f32 %v367_v29, %v366_v25  ;;  %v370_v44 = vmul.f32 %v306_v17, %v306_v17  ;;  %v371_v45 = vmul.f32 %v307_v21, %v307_v21  ;;  %v319_v61 = vld [vmem:[%s2251_s7 + $0x1e8] sm:$0xff]  ;;  %v320_v62 = vld [vmem:[%s2251_s7 + $0x1f0] sm:$0xff]  ;;  %v668_v12 = vld [vmem:[%s2262_s11 + $0x18] sm:$0xff] }
  0xa7   : > { %v437_v38 = vadd.f32 %v436_v23, %v364_v16  ;;  %v369_v50 = vmul.f32 %v305_v24, %v305_v24  ;;  %v372_v52 = vmul.f32 %v308_v31, %v308_v31  ;;  %v374_v53 = vmul.f32 %v310_v32, %v310_v32  ;;  %v666_v63 = vld [vmem:[%s2262_s11 + $0x8] sm:$0xff]  ;;  %v732_v16 = vld [vmem:[%s2262_s11 + $0x218] sm:$0xff]  ;;  %v665_v25 = vld [vmem:[%s2262_s11] sm:$0xff] }
  0xa8   : > { %v442_v57 = vadd.f32 %v441_v43, %v368_v37  ;;  %v373_v58 = vmul.f32 %v309_v39, %v309_v39  ;;  %v446_v59 = vadd.f32 %v371_v45, %v370_v44  ;;  %v375_v60 = vmul.f32 %v311_v41, %v311_v41  ;;  %v730_v15 = vld [vmem:[%s2262_s11 + $0x208] sm:$0xff]  ;;  %v321_v32 = vld [vmem:[%s2251_s7 + $0x1f8] sm:$0xff] }
  0xa9   : > { %424 = vadd.xlane.f32.xlu1 %v423_v22  ;;  %v433_v4 = vadd.f32 %v432_v34, %v361_v13  ;;  %v376_v5 = vmul.f32 %v312_v42, %v312_v42  ;;  %v378_v6 = vmul.f32 %v314_v48, %v314_v48  ;;  %v379_v9 = vmul.f32 %v315_v51, %v315_v51  ;;  %v667_v22 = vld [vmem:[%s2262_s11 + $0x10] sm:$0xff]  ;;  %v729_v13 = vld [vmem:[%s2262_s11 + $0x200] sm:$0xff]  ;;  %v670_v41 = vld [vmem:[%s2262_s11 + $0x28] sm:$0xff] }
  0xaa   : > { %429 = vadd.xlane.f32.xlu0 %v428_v33  ;;  %v438_v17 = vadd.f32 %v437_v38, %v365_v36  ;;  %v447_v21 = vadd.f32 %v446_v59, %v372_v52  ;;  %v451_v23 = vadd.f32 %v375_v60, %v374_v53  ;;  %v380_v24 = vmul.f32 %v316_v54, %v316_v54  ;;  %v731_v39 = vld [vmem:[%s2262_s11 + $0x210] sm:$0xff]  ;;  %v672_v33 = vld [vmem:[%s2262_s11 + $0x38] sm:$0xff]  ;;  %v734_v44 = vld [vmem:[%s2262_s11 + $0x228] sm:$0xff] }
  0xab   : > { %v377_v29 = vmul.f32 %v313_v46, %v313_v46  ;;  %v456_v31 = vadd.f32 %v379_v9, %v378_v6  ;;  %v382_v34 = vmul.f32 %v318_v56, %v318_v56  ;;  %v383_v37 = vmul.f32 %v319_v61, %v319_v61  ;;  %v736_v45 = vld [vmem:[%s2262_s11 + $0x238] sm:$0xff]  ;;  %v669_v48 = vld [vmem:[%s2262_s11 + $0x20] sm:$0xff]  ;;  %v671_v54 = vld [vmem:[%s2262_s11 + $0x30] sm:$0xff] }
  0xac   : > { %v443_v36 = vadd.f32 %v442_v57, %v369_v50  ;;  %v448_v42 = vadd.f32 %v447_v21, %v373_v58  ;;  %v452_v38 = vadd.f32 %v451_v23, %v376_v5  ;;  %v381_v43 = vmul.f32 %v317_v55, %v317_v55  ;;  %v733_v56 = vld [vmem:[%s2262_s11 + $0x220] sm:$0xff]  ;;  %v735_v59 = vld [vmem:[%s2262_s11 + $0x230] sm:$0xff]  ;;  %v674_v60 = vld [vmem:[%s2262_s11 + $0x48] sm:$0xff] }
  0xad   : > { %434 = vadd.xlane.f32.xlu1 %v433_v4  ;;  %v384_v46 = vmul.f32 %v320_v62, %v320_v62  ;;  %v461_v51 = vadd.f32 %v383_v37, %v382_v34  ;;  %v1308_v52 = vpack.c.bf16 %v668_v12, %v666_v63  ;;  %v1372_v53 = vpack.c.bf16 %v732_v16, %v730_v15  ;;  %v676_v61 = vld [vmem:[%s2262_s11 + $0x58] sm:$0xff]  ;;  %v738_v63 = vld [vmem:[%s2262_s11 + $0x248] sm:$0xff]  ;;  %v673_v12 = vld [vmem:[%s2262_s11 + $0x40] sm:$0xff] }
  0xae   : > { %439 = vadd.xlane.f32.xlu0 %v438_v17  ;;  %v457_v50 = vadd.f32 %v456_v31, %v380_v24  ;;  %v1310_v57 = vpack.c.bf16 %v667_v22, %v665_v25  ;;  %v1374_v55 = vpack.c.bf16 %v731_v39, %v729_v13  ;;  %v1312_v58 = vpack.c.bf16 %v672_v33, %v670_v41  ;;  %v740_v4 = vld [vmem:[%s2262_s11 + $0x258] sm:$0xff]  ;;  %v675_v21 = vld [vmem:[%s2262_s11 + $0x50] sm:$0xff]  ;;  %v737_v23 = vld [vmem:[%s2262_s11 + $0x240] sm:$0xff] }
  0xaf   : > { %1309 = vmatprep.subr.bf16.mxu1 %v1308_v52  ;;  %1373 = vmatprep.subr.bf16.mxu0 %v1372_v53  ;;  %v1376_v62 = vpack.c.bf16 %v736_v45, %v734_v44  ;;  %v385_v5 = vmul.f32 %v321_v32, %v321_v32  ;;  %v1314_v6 = vpack.c.bf16 %v671_v54, %v669_v48  ;;  %v739_v24 = vld [vmem:[%s2262_s11 + $0x250] sm:$0xff]  ;;  %v678_v13 = vld [vmem:[%s2262_s11 + $0x68] sm:$0xff]  ;;  %v680_v31 = vld [vmem:[%s2262_s11 + $0x78] sm:$0xff] }
  0xb0   : > { %1311 = vmatpush1.bf16.msra.mxu1 %v1310_v57  ;;  %1375 = vmatpush1.bf16.msra.mxu0 %v1374_v55  ;;  %v1378_v9 = vpack.c.bf16 %v735_v59, %v733_v56  ;;  %v453_v15 = vadd.f32 %v452_v38, %v377_v29  ;;  %v462_v16 = vadd.f32 %v461_v51, %v384_v46  ;;  %v742_v32 = vld [vmem:[%s2262_s11 + $0x268] sm:$0xff]  ;;  %v744_v34 = vld [vmem:[%s2262_s11 + $0x278] sm:$0xff]  ;;  %v677_v39 = vld [vmem:[%s2262_s11 + $0x60] sm:$0xff] }
  0xb1   : > { %444 = vadd.xlane.f32.xlu1 %v443_v36  ;;  %1313 = vmatprep.subr.bf16.mxu1 %v1312_v58  ;;  %v1316_v17 = vpack.c.bf16 %v676_v61, %v674_v60  ;;  %v458_v25 = vadd.f32 %v457_v50, %v381_v43  ;;  %v1380_v22 = vpack.c.bf16 %v740_v4, %v738_v63  ;;  %v679_v41 = vld [vmem:[%s2262_s11 + $0x70] sm:$0xff]  ;;  %v682_v43 = vld [vmem:[%s2262_s11 + $0x88] sm:$0xff]  ;;  %v684_v45 = vld [vmem:[%s2262_s11 + $0x98] sm:$0xff] }
  0xb2   : > { %449 = vadd.xlane.f32.xlu0 %v448_v42  ;;  %1377 = vmatprep.subr.bf16.mxu0 %v1376_v62  ;;  %v1318_v29 = vpack.c.bf16 %v675_v21, %v673_v12  ;;  %v1382_v37 = vpack.c.bf16 %v739_v24, %v737_v23  ;;  %v463_v33 = vadd.f32 %v462_v16, %v385_v5  ;;  %v741_v42 = vld [vmem:[%s2262_s11 + $0x260] sm:$0xff]  ;;  %v743_v38 = vld [vmem:[%s2262_s11 + $0x270] sm:$0xff]  ;;  %v746_v48 = vld [vmem:[%s2262_s11 + $0x288] sm:$0xff] }
  0xb3   : > { %v1320_v36 = vpack.c.bf16 %v680_v31, %v678_v13  ;;  %v1384_v44 = vpack.c.bf16 %v744_v34, %v742_v32  ;;  %v748_v46 = vld [vmem:[%s2262_s11 + $0x298] sm:$0xff]  ;;  %v1322_v51 = vpack.c.bf16 %v679_v41, %v677_v39  ;;  %v1386_v52 = vpack.c.bf16 %v743_v38, %v741_v42  ;;  %v681_v53 = vld [vmem:[%s2262_s11 + $0x80] sm:$0xff]  ;;  %v683_v54 = vld [vmem:[%s2262_s11 + $0x90] sm:$0xff] }
  0xb4   : > { %1315 = vmatpush1.bf16.msra.mxu1 %v1314_v6  ;;  %1379 = vmatpush1.bf16.msra.mxu0 %v1378_v9  ;;  %v1324_v56 = vpack.c.bf16 %v684_v45, %v682_v43  ;;  %v1388_v59 = vpack.c.bf16 %v748_v46, %v746_v48  ;;  %v745_v50 = vld [vmem:[%s2262_s11 + $0x280] sm:$0xff]  ;;  %v747_v57 = vld [vmem:[%s2262_s11 + $0x290] sm:$0xff]  ;;  %v686_v55 = vld [vmem:[%s2262_s11 + $0xa8] sm:$0xff]  ;;  %v1326_v62 = vpack.c.bf16 %v683_v54, %v681_v53 }
  0xb5   : > { %454 = vadd.xlane.f32.xlu1 %v453_v15  ;;  %1317 = vmatprep.subr.bf16.mxu1 %v1316_v17  ;;  %v688_v58 = vld [vmem:[%s2262_s11 + $0xb8] sm:$0xff]  ;;  %v750_v60 = vld [vmem:[%s2262_s11 + $0x2a8] sm:$0xff]  ;;  %v1390_v63 = vpack.c.bf16 %v747_v57, %v745_v50  ;;  %v685_v4 = vld [vmem:[%s2262_s11 + $0xa0] sm:$0xff] }
  0xb6   : > { %459 = vadd.xlane.f32.xlu0 %v458_v25  ;;  %1381 = vmatprep.subr.bf16.mxu0 %v1380_v22  ;;  %v752_v61 = vld [vmem:[%s2262_s11 + $0x2b8] sm:$0xff]  ;;  %v687_v5 = vld [vmem:[%s2262_s11 + $0xb0] sm:$0xff]  ;;  %v1328_v6 = vpack.c.bf16 %v688_v58, %v686_v55  ;;  %v749_v12 = vld [vmem:[%s2262_s11 + $0x2a0] sm:$0xff] }
  0xb7   : > { %v1392_v9 = vpack.c.bf16 %v752_v61, %v750_v60  ;;  %v751_v15 = vld [vmem:[%s2262_s11 + $0x2b0] sm:$0xff]  ;;  %v690_v16 = vld [vmem:[%s2262_s11 + $0xc8] sm:$0xff]  ;;  %v692_v17 = vld [vmem:[%s2262_s11 + $0xd8] sm:$0xff]  ;;  %v1330_v24 = vpack.c.bf16 %v687_v5, %v685_v4 }
  0xb8   : > { %1319 = vmatpush1.bf16.msra.mxu1 %v1318_v29  ;;  %1383 = vmatpush1.bf16.msra.mxu0 %v1382_v37  ;;  %v754_v21 = vld [vmem:[%s2262_s11 + $0x2c8] sm:$0xff]  ;;  %v756_v23 = vld [vmem:[%s2262_s11 + $0x2d8] sm:$0xff]  ;;  %v1394_v25 = vpack.c.bf16 %v751_v15, %v749_v12  ;;  %v689_v22 = vld [vmem:[%s2262_s11 + $0xc0] sm:$0xff]  ;;  %v1332_v31 = vpack.c.bf16 %v692_v17, %v690_v16 }
  0xb9   : > { %464 = vadd.xlane.f32.xlu1 %v463_v33  ;;  %1321 = vmatprep.subr.bf16.mxu1 %v1320_v36  ;;  %v691_v13 = vld [vmem:[%s2262_s11 + $0xd0] sm:$0xff]  ;;  %v1396_v32 = vpack.c.bf16 %v756_v23, %v754_v21  ;;  %v753_v34 = vld [vmem:[%s2262_s11 + $0x2c0] sm:$0xff]  ;;  %v694_v37 = vld [vmem:[%s2262_s11 + $0xe8] sm:$0xff] }
  0xba   : > { %1385 = vmatprep.subr.bf16.mxu0 %v1384_v44  ;;  %v755_v29 = vld [vmem:[%s2262_s11 + $0x2d0] sm:$0xff]  ;;  %v696_v39 = vld [vmem:[%s2262_s11 + $0xf8] sm:$0xff]  ;;  %v758_v41 = vld [vmem:[%s2262_s11 + $0x2e8] sm:$0xff]  ;;  %v1334_v36 = vpack.c.bf16 %v691_v13, %v689_v22 }
  0xbb   : > { %v760_v33 = vld [vmem:[%s2262_s11 + $0x2f8] sm:$0xff]  ;;  %v1398_v42 = vpack.c.bf16 %v755_v29, %v753_v34  ;;  %v693_v38 = vld [vmem:[%s2262_s11 + $0xe0] sm:$0xff]  ;;  %v695_v43 = vld [vmem:[%s2262_s11 + $0xf0] sm:$0xff]  ;;  %v1336_v44 = vpack.c.bf16 %v696_v39, %v694_v37 }
  0xbc   : > { %1323 = vmatpush1.bf16.msra.mxu1 %v1322_v51  ;;  %1387 = vmatpush1.bf16.msra.mxu0 %v1386_v52  ;;  %v1400_v45 = vpack.c.bf16 %v760_v33, %v758_v41  ;;  %v757_v48 = vld [vmem:[%s2262_s11 + $0x2e0] sm:$0xff]  ;;  %v759_v46 = vld [vmem:[%s2262_s11 + $0x2f0] sm:$0xff]  ;;  %v698_v51 = vld [vmem:[%s2262_s11 + $0x108] sm:$0xff] }
  0xbd   : > { %1325 = vmatprep.subr.bf16.mxu1 %v1324_v56  ;;  %1389 = vmatprep.subr.bf16.mxu0 %v1388_v59  ;;  %v700_v52 = vld [vmem:[%s2262_s11 + $0x118] sm:$0xff]  ;;  %v762_v53 = vld [vmem:[%s2262_s11 + $0x308] sm:$0xff]  ;;  %v1338_v56 = vpack.c.bf16 %v695_v43, %v693_v38  ;;  %v1402_v59 = vpack.c.bf16 %v759_v46, %v757_v48  ;;  %v697_v50 = vld [vmem:[%s2262_s11 + $0x100] sm:$0xff] }
  0xbe   : > { %v764_v54 = vld [vmem:[%s2262_s11 + $0x318] sm:$0xff]  ;;  %v699_v57 = vld [vmem:[%s2262_s11 + $0x110] sm:$0xff]  ;;  %v1340_v55 = vpack.c.bf16 %v700_v52, %v698_v51  ;;  %v761_v60 = vld [vmem:[%s2262_s11 + $0x300] sm:$0xff] }
  0xbf   : > { %v1404_v58 = vpack.c.bf16 %v764_v54, %v762_v53  ;;  %v763_v61 = vld [vmem:[%s2262_s11 + $0x310] sm:$0xff]  ;;  %v766_v4 = vld [vmem:[%s2262_s11 + $0x328] sm:$0xff]  ;;  %v768_v5 = vld [vmem:[%s2262_s11 + $0x338] sm:$0xff] }
  0xc0   : > { %1327 = vmatpush1.bf16.msra.mxu1 %v1326_v62  ;;  %1391 = vmatpush1.bf16.msra.mxu0 %v1390_v63  ;;  %v702_v62 = vld [vmem:[%s2262_s11 + $0x128] sm:$0xff]  ;;  %v704_v63 = vld [vmem:[%s2262_s11 + $0x138] sm:$0xff]  ;;  %v701_v12 = vld [vmem:[%s2262_s11 + $0x120] sm:$0xff]  ;;  %v1408_v17 = vpack.c.bf16 %v768_v5, %v766_v4 }
  0xc1   : > { %1329 = vmatprep.subr.bf16.mxu1 %v1328_v6  ;;  %1393 = vmatprep.subr.bf16.mxu0 %v1392_v9  ;;  %v1342_v6 = vpack.c.bf16 %v699_v57, %v697_v50  ;;  %v1406_v9 = vpack.c.bf16 %v763_v61, %v761_v60  ;;  %v703_v15 = vld [vmem:[%s2262_s11 + $0x130] sm:$0xff]  ;;  %v1344_v16 = vpack.c.bf16 %v704_v63, %v702_v62  ;;  %v765_v21 = vld [vmem:[%s2262_s11 + $0x320] sm:$0xff]  ;;  %v770_v22 = vld [vmem:[%s2262_s11 + $0x348] sm:$0xff] }
  0xc2   : > { %v767_v23 = vld [vmem:[%s2262_s11 + $0x330] sm:$0xff]  ;;  %v772_v13 = vld [vmem:[%s2262_s11 + $0x358] sm:$0xff]  ;;  %v705_v34 = vld [vmem:[%s2262_s11 + $0x140] sm:$0xff] }
  0xc3   : > { %v707_v29 = vld [vmem:[%s2262_s11 + $0x150] sm:$0xff]  ;;  %v1412_v39 = vpack.c.bf16 %v772_v13, %v770_v22  ;;  %v769_v41 = vld [vmem:[%s2262_s11 + $0x340] sm:$0xff]  ;;  %v774_v38 = vld [vmem:[%s2262_s11 + $0x368] sm:$0xff] }
  0xc4   : > { %1331 = vmatpush1.bf16.msra.mxu1 %v1330_v24  ;;  %1395 = vmatpush1.bf16.msra.mxu0 %v1394_v25  ;;  %v706_v24 = vld [vmem:[%s2262_s11 + $0x148] sm:$0xff]  ;;  %v708_v25 = vld [vmem:[%s2262_s11 + $0x158] sm:$0xff]  ;;  %v771_v33 = vld [vmem:[%s2262_s11 + $0x350] sm:$0xff] }
  0xc5   : > { %1333 = vmatprep.subr.bf16.mxu1 %v1332_v31  ;;  %1397 = vmatprep.subr.bf16.mxu0 %v1396_v32  ;;  %v1346_v31 = vpack.c.bf16 %v703_v15, %v701_v12  ;;  %v1410_v32 = vpack.c.bf16 %v767_v23, %v765_v21  ;;  %v1348_v37 = vpack.c.bf16 %v708_v25, %v706_v24  ;;  %v776_v43 = vld [vmem:[%s2262_s11 + $0x378] sm:$0xff]  ;;  %v709_v48 = vld [vmem:[%s2262_s11 + $0x160] sm:$0xff]  ;;  %v711_v46 = vld [vmem:[%s2262_s11 + $0x170] sm:$0xff] }
  0xc6   : > { %v1416_v52 = vpack.c.bf16 %v776_v43, %v774_v38  ;;  %v773_v53 = vld [vmem:[%s2262_s11 + $0x360] sm:$0xff]  ;;  %v775_v54 = vld [vmem:[%s2262_s11 + $0x370] sm:$0xff]  ;;  %v778_v50 = vld [vmem:[%s2262_s11 + $0x388] sm:$0xff] }
  0xc7   : > { %v780_v57 = vld [vmem:[%s2262_s11 + $0x398] sm:$0xff]  ;;  %v713_v60 = vld [vmem:[%s2262_s11 + $0x180] sm:$0xff]  ;;  %v715_v61 = vld [vmem:[%s2262_s11 + $0x190] sm:$0xff] }
  0xc8   : > { %1335 = vmatpush1.bf16.msra.mxu1 %v1334_v36  ;;  %1399 = vmatpush1.bf16.msra.mxu0 %v1398_v42  ;;  %v710_v36 = vld [vmem:[%s2262_s11 + $0x168] sm:$0xff]  ;;  %v712_v42 = vld [vmem:[%s2262_s11 + $0x178] sm:$0xff]  ;;  %v1420_v63 = vpack.c.bf16 %v780_v57, %v778_v50  ;;  %v777_v4 = vld [vmem:[%s2262_s11 + $0x380] sm:$0xff] }
  0xc9   : > { %1337 = vmatprep.subr.bf16.mxu1 %v1336_v44  ;;  %1401 = vmatprep.subr.bf16.mxu0 %v1400_v45  ;;  %v1350_v44 = vpack.c.bf16 %v707_v29, %v705_v34  ;;  %v1414_v45 = vpack.c.bf16 %v771_v33, %v769_v41  ;;  %v1352_v51 = vpack.c.bf16 %v712_v42, %v710_v36  ;;  %v779_v5 = vld [vmem:[%s2262_s11 + $0x390] sm:$0xff]  ;;  %v782_v12 = vld [vmem:[%s2262_s11 + $0x3a8] sm:$0xff]  ;;  %v784_v15 = vld [vmem:[%s2262_s11 + $0x3b8] sm:$0xff] }
  0xca   : > { %v717_v21 = vld [vmem:[%s2262_s11 + $0x1a0] sm:$0xff]  ;;  %v719_v23 = vld [vmem:[%s2262_s11 + $0x1b0] sm:$0xff]  ;;  %v1424_v25 = vpack.c.bf16 %v784_v15, %v782_v12  ;;  %v786_v34 = vld [vmem:[%s2262_s11 + $0x3c8] sm:$0xff] }
  0xcb   : > { %v781_v22 = vld [vmem:[%s2262_s11 + $0x3a0] sm:$0xff]  ;;  %v783_v13 = vld [vmem:[%s2262_s11 + $0x3b0] sm:$0xff]  ;;  %v788_v29 = vld [vmem:[%s2262_s11 + $0x3d8] sm:$0xff] }
  0xcc   : > { %1339 = vmatpush1.bf16.msra.mxu1 %v1338_v56  ;;  %1403 = vmatpush1.bf16.msra.mxu0 %v1402_v59  ;;  %v714_v56 = vld [vmem:[%s2262_s11 + $0x188] sm:$0xff]  ;;  %v716_v59 = vld [vmem:[%s2262_s11 + $0x198] sm:$0xff]  ;;  %v721_v41 = vld [vmem:[%s2262_s11 + $0x1c0] sm:$0xff]  ;;  %v1428_v42 = vpack.c.bf16 %v788_v29, %v786_v34 }
  0xcd   : > { %1341 = vmatprep.subr.bf16.mxu1 %v1340_v55  ;;  %1405 = vmatprep.subr.bf16.mxu0 %v1404_v58  ;;  %v1354_v55 = vpack.c.bf16 %v711_v46, %v709_v48  ;;  %v1418_v58 = vpack.c.bf16 %v775_v54, %v773_v53  ;;  %v1356_v62 = vpack.c.bf16 %v716_v59, %v714_v56  ;;  %v723_v33 = vld [vmem:[%s2262_s11 + $0x1d0] sm:$0xff]  ;;  %v785_v38 = vld [vmem:[%s2262_s11 + $0x3c0] sm:$0xff]  ;;  %v790_v48 = vld [vmem:[%s2262_s11 + $0x3e8] sm:$0xff] }
  0xce   : > { %v787_v43 = vld [vmem:[%s2262_s11 + $0x3d0] sm:$0xff]  ;;  %v792_v46 = vld [vmem:[%s2262_s11 + $0x3f8] sm:$0xff]  ;;  %v725_v53 = vld [vmem:[%s2262_s11 + $0x1e0] sm:$0xff] }
  0xcf   : > { %v1432_v56 = vpack.c.bf16 %v792_v46, %v790_v48  ;;  %v727_v59 = vld [vmem:[%s2262_s11 + $0x1f0] sm:$0xff]  ;;  %v789_v50 = vld [vmem:[%s2262_s11 + $0x3e0] sm:$0xff]  ;;  %v579_v29 = vld [vmem:[#allocation5] sm:$0xf] }
  0xd0   : > { %1343 = vmatpush1.bf16.msra.mxu1 %v1342_v6  ;;  %1407 = vmatpush1.bf16.msra.mxu0 %v1406_v9  ;;  %v718_v6 = vld [vmem:[%s2262_s11 + $0x1a8] sm:$0xff]  ;;  %v720_v9 = vld [vmem:[%s2262_s11 + $0x1b8] sm:$0xff]  ;;  %v791_v57 = vld [vmem:[%s2262_s11 + $0x3f0] sm:$0xff] }
  0xd1   : > { %1345 = vmatprep.subr.bf16.mxu1 %v1344_v16  ;;  %1409 = vmatprep.subr.bf16.mxu0 %v1408_v17  ;;  %v1358_v16 = vpack.c.bf16 %v715_v61, %v713_v60  ;;  %v1422_v17 = vpack.c.bf16 %v779_v5, %v777_v4  ;;  %v1360_v24 = vpack.c.bf16 %v720_v9, %v718_v6 }
  0xd4   : > { %1347 = vmatpush1.bf16.msra.mxu1 %v1346_v31  ;;  %1411 = vmatpush1.bf16.msra.mxu0 %v1410_v32  ;;  %v722_v31 = vld [vmem:[%s2262_s11 + $0x1c8] sm:$0xff]  ;;  %v724_v32 = vld [vmem:[%s2262_s11 + $0x1d8] sm:$0xff] }
  0xd5   : > { %1349 = vmatprep.subr.bf16.mxu1 %v1348_v37  ;;  %1413 = vmatprep.subr.bf16.mxu0 %v1412_v39  ;;  %v1362_v37 = vpack.c.bf16 %v719_v23, %v717_v21  ;;  %v1426_v39 = vpack.c.bf16 %v783_v13, %v781_v22  ;;  %v1364_v36 = vpack.c.bf16 %v724_v32, %v722_v31 }
  0xd8   : > { %1351 = vmatpush1.bf16.msra.mxu1 %v1350_v44  ;;  %1415 = vmatpush1.bf16.msra.mxu0 %v1414_v45  ;;  %v726_v44 = vld [vmem:[%s2262_s11 + $0x1e8] sm:$0xff]  ;;  %v728_v45 = vld [vmem:[%s2262_s11 + $0x1f8] sm:$0xff] }
  0xd9   : > { %1353 = vmatprep.subr.bf16.mxu1 %v1352_v51  ;;  %1417 = vmatprep.subr.bf16.mxu0 %v1416_v52  ;;  %v1366_v51 = vpack.c.bf16 %v723_v33, %v721_v41  ;;  %v1430_v52 = vpack.c.bf16 %v787_v43, %v785_v38  ;;  %v1368_v54 = vpack.c.bf16 %v728_v45, %v726_v44 }
  0xdc   : > { %1355 = vmatpush1.bf16.msra.mxu1 %v1354_v55  ;;  %1419 = vmatpush1.bf16.msra.mxu0 %v1418_v58  ;;  %v1370_v55 = vpack.c.bf16 %v727_v59, %v725_v53  ;;  %v1434_v58 = vpack.c.bf16 %v791_v57, %v789_v50 }
  0xdd   : > { %1357 = vmatprep.subr.bf16.mxu1 %v1356_v62  ;;  %1421 = vmatprep.subr.bf16.mxu0 %v1420_v63  ;;  %v581_v62 = vlaneseq }
  0xdf   : > { %v582_v15 = vshrl.u32 %v581_v62, 7 }
  0xe0   : > { %1359 = vmatpush1.bf16.msra.mxu1 %v1358_v16  ;;  %1423 = vmatpush1.bf16.msra.mxu0 %v1422_v17 }
  0xe1   : > { %1361 = vmatprep.subr.bf16.mxu1 %v1360_v24  ;;  %1425 = vmatprep.subr.bf16.mxu0 %v1424_v25  ;;  %v587_v22 = vsub.s32 1, %v582_v15  ;;  %v595_v13 = vsub.s32 3, %v582_v15  ;;  %v583_v31 = vsub.s32 0, %v582_v15 }
  0xe3   : > { %v2542_v38 = vrot.slane %v579_v29, %v595_v13  ;;  %v2544_v43 = vrot.slane %v579_v29, %v583_v31 }
  0xe4   : > { %1363 = vmatpush1.bf16.msra.mxu1 %v1362_v37  ;;  %1427 = vmatpush1.bf16.msra.mxu0 %v1426_v39  ;;  %v591_v37 = vsub.s32 2, %v582_v15 }
  0xe5   : > { %1365 = vmatprep.subr.bf16.mxu1 %v1364_v36  ;;  %1429 = vmatprep.subr.bf16.mxu0 %v1428_v42  ;;  %v2540_v42 = vrot.slane %v579_v29, %v587_v22 }
  0xe6   : > { %v2546_v45 = vrot.slane %v579_v29, %v591_v37 }
  0xe8   : > { %1367 = vmatpush1.bf16.msra.mxu1 %v1366_v51  ;;  %1431 = vmatpush1.bf16.msra.mxu0 %v1430_v52 }
  0xe9   : > { %1369 = vmatprep.subr.bf16.mxu1 %v1368_v54  ;;  %1433 = vmatprep.subr.bf16.mxu0 %v1432_v56 }
  0xec   : > { %1371 = vmatpush1.bf16.msra.mxu1 %v1370_v55  ;;  %1435 = vmatpush1.bf16.msra.mxu0 %v1434_v58 }
 0x127   : > { %v390_v60 = vpop.xlane.xlu0 %389 }
 0x128   : > { %v467_v61 = vmul.f32 0.001953125, %v390_v60 }
 0x12a   : > { %v483_v63 = vadd.f32 1e-06, %v467_v61  ;;  %v400_v4 = vpop.xlane.xlu1 %399 }
 0x12b   : > { %v395_v5 = vpop.xlane.xlu0 %394  ;;  %v469_v6 = vmul.f32 0.001953125, %v400_v4 }
 0x12c   : > { %1619 = vrsqrt.f32 %v483_v63  ;;  %v468_v9 = vmul.f32 0.001953125, %v395_v5 }
 0x12d   : > { %v485_v12 = vadd.f32 1e-06, %v469_v6 }
 0x12e   : > { %v484_v16 = vadd.f32 1e-06, %v468_v9  ;;  %v405_v17 = vpop.xlane.xlu1 %404 }
 0x12f   : > { %1621 = vrsqrt.f32 %v485_v12  ;;  %v470_v21 = vmul.f32 0.001953125, %v405_v17  ;;  %v410_v23 = vpop.xlane.xlu0 %409 }
 0x130   : > { %1623 = vrsqrt.f32 %v484_v16  ;;  %v471_v24 = vmul.f32 0.001953125, %v410_v23 }
 0x131   : > { %v486_v25 = vadd.f32 1e-06, %v470_v21 }
 0x132   : > { %v487_v32 = vadd.f32 1e-06, %v471_v24  ;;  %v415_v34 = vpop.xlane.xlu1 %414 }
 0x133   : > { %1625 = vrsqrt.f32 %v486_v25  ;;  %v472_v39 = vmul.f32 0.001953125, %v415_v34  ;;  %v420_v41 = vpop.xlane.xlu0 %419 }
 0x134   : > { %1627 = vrsqrt.f32 %v487_v32  ;;  %v473_v33 = vmul.f32 0.001953125, %v420_v41 }
 0x135   : > { %v488_v36 = vadd.f32 1e-06, %v472_v39  ;;  %v1651_v39 = vld [vmem:[%s2251_s7 + $0x80] sm:$0xff] }
 0x136   : > { %v1620_v44 = vpop.eup %1619  ;;  %v425_v48 = vpop.xlane.xlu1 %424  ;;  %v489_v56 = vadd.f32 1e-06, %v473_v33  ;;  %v1652_v33 = vld [vmem:[%s2251_s7 + $0x90] sm:$0xff] }
 0x137   : > { %1629 = vrsqrt.f32 %v488_v36  ;;  %v516_v46 = vmul.f32 %v1620_v44, %v2272_v1  ;;  %v518_v51 = vmul.f32 %v1620_v44, %v2278_v3  ;;  %v515_v52 = vmul.f32 %v1620_v44, %v2269_v0  ;;  %v430_v53 = vpop.xlane.xlu0 %429 }
 0x138   : > { %v517_v54 = vmul.f32 %v1620_v44, %v2275_v2  ;;  %v474_v59 = vmul.f32 0.001953125, %v425_v48  ;;  %v475_v0 = vmul.f32 0.001953125, %v430_v53  ;;  %1631 = vrsqrt.f32 %v489_v56 }
 0x139   : > { %v1622_v50 = vpop.eup %1621  ;;  %v602_v57 = vmul.f32 %v2540_v42, %v516_v46  ;;  %v604_v55 = vmul.f32 %v2542_v38, %v518_v51  ;;  %v601_v58 = vmul.f32 %v2544_v43, %v515_v52 }
 0x13a   : > { %v1624_v60 = vpop.eup %1623  ;;  %v603_v61 = vmul.f32 %v2546_v45, %v517_v54  ;;  %v524_v1 = vmul.f32 %v1622_v50, %v2312_v18  ;;  %v526_v3 = vmul.f32 %v1622_v50, %v2318_v20  ;;  %v490_v4 = vadd.f32 1e-06, %v474_v59  ;;  %v1653_v54 = vld [vmem:[%s2251_s7 + $0xa0] sm:$0xff] }
 0x13b   : > { %857 = vmatprep.mubr.f32.mxu1 %v602_v57  ;;  %1018 = vmatprep.mubr.f32.mxu0 %v604_v55  ;;  %v520_v2 = vmul.f32 %v1624_v60, %v2290_v8  ;;  %v522_v62 = vmul.f32 %v1624_v60, %v2298_v11  ;;  %v519_v63 = vmul.f32 %v1624_v60, %v2287_v7  ;;  %v435_v7 = vpop.xlane.xlu1 %434  ;;  %v491_v23 = vadd.f32 1e-06, %v475_v0  ;;  %v440_v25 = vpop.xlane.xlu0 %439  ;;  %v1654_v57 = vld [vmem:[%s2251_s7 + $0xb0] sm:$0xff] }
 0x13c   : > { %858 = vmatmul.mubr.f32.vlgmr.msra.gmra.mrb[0].mxu1 %v601_v58  ;;  %1019 = vmatmul.mubr.f32.vlgmr.msra.gmra.mrb[0].mxu0 %v603_v61  ;;  %v521_v5 = vmul.f32 %v1624_v60, %v2295_v10  ;;  %v610_v6 = vmul.f32 %v2540_v42, %v524_v1  ;;  %v612_v18 = vmul.f32 %v2542_v38, %v526_v3  ;;  %1633 = vrsqrt.f32 %v490_v4  ;;  %v1655_v60 = vld [vmem:[%s2251_s7 + $0xc8] sm:$0xff]  ;;  %v1656_v1 = vld [vmem:[%s2251_s7 + $0xd8] sm:$0xff] }
 0x13d   : > { %v1626_v20 = vpop.eup %1625  ;;  %v606_v9 = vmul.f32 %v2540_v42, %v520_v2  ;;  %v608_v12 = vmul.f32 %v2542_v38, %v522_v62  ;;  %v605_v8 = vmul.f32 %v2544_v43, %v519_v63  ;;  %v523_v11 = vmul.f32 %v1622_v50, %v2305_v14  ;;  %v1657_v63 = vld [vmem:[%s2251_s7 + $0xc0] sm:$0xff] }
 0x13e   : > { %v1628_v15 = vpop.eup %1627  ;;  %v607_v16 = vmul.f32 %v2546_v45, %v521_v5  ;;  %v525_v17 = vmul.f32 %v1622_v50, %v2315_v19  ;;  %v528_v10 = vmul.f32 %v1626_v20, %v2332_v27  ;;  %v530_v21 = vmul.f32 %v1626_v20, %v2338_v30 }
 0x13f   : > { %863 = vmatprep.mubr.f32.mxu1 %v606_v9  ;;  %1024 = vmatprep.mubr.f32.mxu0 %v608_v12  ;;  %v527_v24 = vmul.f32 %v1626_v20, %v2329_v26  ;;  %v609_v14 = vmul.f32 %v2544_v43, %v523_v11  ;;  %v529_v19 = vmul.f32 %v1626_v20, %v2335_v28  ;;  %v476_v13 = vmul.f32 0.001953125, %v435_v7  ;;  %v445_v48 = vpop.xlane.xlu1 %444  ;;  %v450_v0 = vpop.xlane.xlu0 %449  ;;  %v1659_v20 = vld [vmem:[%s2251_s7 + $0xe8] sm:$0xff] }
 0x140   : > { %864 = vmatmul.mubr.f32.gmra.mrb[2].mxu1 %v605_v8  ;;  %1025 = vmatmul.mubr.f32.gmra.mrb[2].mxu0 %v607_v16  ;;  %v611_v22 = vmul.f32 %v2546_v45, %v525_v17  ;;  %v614_v30 = vmul.f32 %v2540_v42, %v528_v10  ;;  %v616_v31 = vmul.f32 %v2542_v38, %v530_v21  ;;  %v477_v34 = vmul.f32 0.001953125, %v440_v25  ;;  %v1661_v10 = vld [vmem:[%s2251_s7 + $0xe0] sm:$0xff] }
 0x141   : > { %v1630_v27 = vpop.eup %1629  ;;  %869 = vmatprep.mubr.f32.mxu1 %v610_v6  ;;  %1030 = vmatprep.mubr.f32.mxu0 %v612_v18  ;;  %v532_v26 = vmul.f32 %v1628_v15, %v2348_v35  ;;  %v534_v32 = vmul.f32 %v1628_v15, %v2354_v40  ;;  %v613_v29 = vmul.f32 %v2544_v43, %v527_v24  ;;  %v492_v37 = vadd.f32 1e-06, %v476_v13  ;;  %v1658_v6 = vld [vmem:[%s2251_s7 + $0xd0] sm:$0xff] }
 0x142   : > { %v531_v41 = vmul.f32 %v1651_v39, %v1628_v15  ;;  %1635 = vrsqrt.f32 %v491_v23  ;;  %v615_v28 = vmul.f32 %v2546_v45, %v529_v19  ;;  %v533_v36 = vmul.f32 %v1652_v33, %v1628_v15  ;;  %v1632_v51 = vpop.eup %1631  ;;  %v1660_v15 = vld [vmem:[%s2251_s7 + $0xf8] sm:$0xff]  ;;  %v1662_v23 = vld [vmem:[%s2251_s7 + $0xf0] sm:$0xff]  ;;  %v1665_v33 = vld [vmem:[%s2251_s7 + $0x100] sm:$0xff] }
 0x143   : > { %v536_v44 = vmul.f32 %v1630_v27, %v2360_v47  ;;  %v618_v35 = vmul.f32 %v2540_v42, %v532_v26  ;;  %v620_v40 = vmul.f32 %v2542_v38, %v534_v32  ;;  %v538_v46 = vmul.f32 %v1630_v27, %v2364_v49  ;;  %v455_v8 = vpop.xlane.xlu1 %454  ;;  %v1663_v26 = vld [vmem:[%s2251_s7 + $0x108] sm:$0xff] }
 0x144   : > { %870 = vmatmul.mubr.f32.gmra.mrb[4].mxu1 %v609_v14  ;;  %1031 = vmatmul.mubr.f32.gmra.mrb[4].mxu0 %v611_v22  ;;  %v493_v52 = vadd.f32 1e-06, %v477_v34  ;;  %1637 = vrsqrt.f32 %v492_v37  ;;  %v617_v53 = vmul.f32 %v2544_v43, %v531_v41  ;;  %v535_v56 = vmul.f32 %v1653_v54, %v1630_v27  ;;  %v1664_v34 = vld [vmem:[%s2251_s7 + $0x118] sm:$0xff] }
 0x145   : > { %875 = vmatprep.mubr.f32.mxu1 %v614_v30  ;;  %1036 = vmatprep.mubr.f32.mxu0 %v616_v31  ;;  %v478_v47 = vmul.f32 0.001953125, %v445_v48  ;;  %v619_v59 = vmul.f32 %v2546_v45, %v533_v36  ;;  %v622_v50 = vmul.f32 %v2540_v42, %v536_v44  ;;  %v537_v55 = vmul.f32 %v1654_v57, %v1630_v27  ;;  %v460_v27 = vpop.xlane.xlu0 %459  ;;  %v1666_v44 = vld [vmem:[%s2251_s7 + $0x110] sm:$0xff]  ;;  %v1668_v54 = vld [vmem:[%s2251_s7 + $0x138] sm:$0xff] }
 0x146   : > { %v1634_v49 = vpop.eup %1633  ;;  %v624_v58 = vmul.f32 %v2542_v38, %v538_v46  ;;  %v540_v61 = vmul.f32 %v1655_v60, %v1632_v51  ;;  %v542_v3 = vmul.f32 %v1656_v1, %v1632_v51  ;;  %1639 = vrsqrt.f32 %v493_v52 }
 0x147   : > { %v621_v2 = vmul.f32 %v2544_v43, %v535_v56  ;;  %v494_v62 = vadd.f32 1e-06, %v478_v47  ;;  %v539_v4 = vmul.f32 %v1657_v63, %v1632_v51  ;;  %v623_v5 = vmul.f32 %v2546_v45, %v537_v55  ;;  %v465_v46 = vpop.xlane.xlu1 %464  ;;  %v1669_v47 = vld [vmem:[%s2251_s7 + $0x120] sm:$0xff] }
 0x148   : > { %876 = vmatmul.mubr.f32.gmra.mrb[6].mxu1 %v613_v29  ;;  %1037 = vmatmul.mubr.f32.gmra.mrb[6].mxu0 %v615_v28  ;;  %v541_v18 = vmul.f32 %v1658_v6, %v1632_v51  ;;  %v544_v9 = vmul.f32 %v1659_v20, %v1634_v49  ;;  %v479_v12 = vmul.f32 0.001953125, %v450_v0  ;;  %v626_v11 = vmul.f32 %v2540_v42, %v540_v61  ;;  %v1671_v0 = vld [vmem:[%s2251_s7 + $0x148] sm:$0xff] }
 0x149   : > { %881 = vmatprep.mubr.f32.mxu1 %v618_v35  ;;  %1042 = vmatprep.mubr.f32.mxu0 %v620_v40  ;;  %v628_v7 = vmul.f32 %v2542_v38, %v542_v3  ;;  %v546_v16 = vmul.f32 %v1660_v15, %v1634_v49  ;;  %1641 = vrsqrt.f32 %v494_v62  ;;  %v543_v21 = vmul.f32 %v1661_v10, %v1634_v49  ;;  %v1667_v35 = vld [vmem:[%s2251_s7 + $0x128] sm:$0xff]  ;;  %v1672_v62 = vld [vmem:[%s2251_s7 + $0x158] sm:$0xff] }
 0x14a   : > { %v545_v24 = vmul.f32 %v1662_v23, %v1634_v49  ;;  %v480_v25 = vmul.f32 0.001953125, %v455_v8  ;;  %v625_v14 = vmul.f32 %v2544_v43, %v539_v4  ;;  %v627_v22 = vmul.f32 %v2546_v45, %v541_v18  ;;  %v1673_v18 = vld [vmem:[%s2251_s7 + $0x140] sm:$0xff]  ;;  %v1675_v8 = vld [vmem:[%s2251_s7 + $0x168] sm:$0xff] }
 0x14b   : > { %v630_v19 = vmul.f32 %v2540_v42, %v544_v9  ;;  %v495_v13 = vadd.f32 1e-06, %v479_v12  ;;  %v632_v31 = vmul.f32 %v2542_v38, %v546_v16  ;;  %v629_v37 = vmul.f32 %v2544_v43, %v543_v21  ;;  %v1674_v9 = vld [vmem:[%s2251_s7 + $0x150] sm:$0xff]  ;;  %v1676_v16 = vld [vmem:[%s2251_s7 + $0x178] sm:$0xff]  ;;  %v1677_v21 = vld [vmem:[%s2251_s7 + $0x160] sm:$0xff] }
 0x14c   : > { %882 = vmatmul.mubr.f32.gmra.mrb[8].mxu1 %v617_v53  ;;  %1043 = vmatmul.mubr.f32.gmra.mrb[8].mxu0 %v619_v59  ;;  %v1636_v17 = vpop.eup %1635  ;;  %v631_v39 = vmul.f32 %v2546_v45, %v545_v24  ;;  %v496_v41 = vadd.f32 1e-06, %v480_v25  ;;  %v481_v28 = vmul.f32 0.001953125, %v460_v27  ;;  %v482_v55 = vmul.f32 0.001953125, %v465_v46  ;;  %v1678_v24 = vld [vmem:[%s2251_s7 + $0x170] sm:$0xff] }
 0x14d   : > { %887 = vmatprep.mubr.f32.mxu1 %v622_v50  ;;  %1048 = vmatprep.mubr.f32.mxu0 %v624_v58  ;;  %v548_v32 = vmul.f32 %v1663_v26, %v1636_v17  ;;  %v550_v29 = vmul.f32 %v1664_v34, %v1636_v17  ;;  %1643 = vrsqrt.f32 %v495_v13  ;;  %v547_v36 = vmul.f32 %v1665_v33, %v1636_v17  ;;  %v1670_v50 = vld [vmem:[%s2251_s7 + $0x130] sm:$0xff]  ;;  %v1680_v26 = vld [vmem:[%s2251_s7 + $0x198] sm:$0xff]  ;;  %v1683_v33 = vld [vmem:[%s2251_s7 + $0x1a8] sm:$0xff] }
 0x14e   : > { %v1638_v30 = vpop.eup %1637  ;;  %v549_v48 = vmul.f32 %v1666_v44, %v1636_v17  ;;  %1645 = vrsqrt.f32 %v496_v41  ;;  %v497_v61 = vadd.f32 1e-06, %v481_v28  ;;  %v498_v6 = vadd.f32 1e-06, %v482_v55  ;;  %v1682_v41 = vld [vmem:[%s2251_s7 + $0x190] sm:$0xff]  ;;  %v1687_v55 = vld [vmem:[%s2251_s7 + $0x1c8] sm:$0xff] }
 0x14f   : > { %v552_v40 = vmul.f32 %v1667_v35, %v1638_v30  ;;  %v634_v52 = vmul.f32 %v2540_v42, %v548_v32  ;;  %v636_v53 = vmul.f32 %v2542_v38, %v550_v29  ;;  %v554_v56 = vmul.f32 %v1668_v54, %v1638_v30  ;;  %v1684_v35 = vld [vmem:[%s2251_s7 + $0x1b8] sm:$0xff] }
 0x150   : > { %888 = vmatmul.mubr.f32.gmra.mrb[10].mxu1 %v621_v2  ;;  %1049 = vmatmul.mubr.f32.gmra.mrb[10].mxu0 %v623_v5  ;;  %v1640_v51 = vpop.eup %1639  ;;  %v551_v59 = vmul.f32 %v1669_v47, %v1638_v30  ;;  %v553_v57 = vmul.f32 %v1670_v50, %v1638_v30  ;;  %v633_v49 = vmul.f32 %v2544_v43, %v547_v36  ;;  %1647 = vrsqrt.f32 %v497_v61  ;;  %v1679_v30 = vld [vmem:[%s2251_s7 + $0x188] sm:$0xff] }
 0x151   : > { %893 = vmatprep.mubr.f32.mxu1 %v626_v11  ;;  %1054 = vmatprep.mubr.f32.mxu0 %v628_v7  ;;  %v635_v58 = vmul.f32 %v2546_v45, %v549_v48  ;;  %v638_v60 = vmul.f32 %v2540_v42, %v552_v40  ;;  %v640_v3 = vmul.f32 %v2542_v38, %v554_v56  ;;  %1649 = vrsqrt.f32 %v498_v6 }
 0x152   : > { %v556_v2 = vmul.f32 %v1671_v0, %v1640_v51  ;;  %v558_v63 = vmul.f32 %v1672_v62, %v1640_v51  ;;  %v637_v4 = vmul.f32 %v2544_v43, %v551_v59  ;;  %v639_v5 = vmul.f32 %v2546_v45, %v553_v57 }
 0x153   : > { %v1642_v1 = vpop.eup %1641  ;;  %v555_v20 = vmul.f32 %v1673_v18, %v1640_v51  ;;  %v557_v12 = vmul.f32 %v1674_v9, %v1640_v51  ;;  %v1685_v51 = vld [vmem:[%s2251_s7 + $0x1a0] sm:$0xff]  ;;  %v1692_v18 = vld [vmem:[%s2251_s7 + $0x1f8] sm:$0xff] }
 0x154   : > { %894 = vmatmul.mubr.f32.gmra.mrb[12].mxu1 %v625_v14  ;;  %1055 = vmatmul.mubr.f32.gmra.mrb[12].mxu0 %v627_v22  ;;  %v560_v11 = vmul.f32 %v1675_v8, %v1642_v1  ;;  %v642_v7 = vmul.f32 %v2540_v42, %v556_v2  ;;  %v644_v15 = vmul.f32 %v2542_v38, %v558_v63  ;;  %v1690_v2 = vld [vmem:[%s2251_s7 + $0x1d0] sm:$0xff]  ;;  %v1691_v63 = vld [vmem:[%s2251_s7 + $0x1e8] sm:$0xff]  ;;  %v1693_v9 = vld [vmem:[%s2251_s7 + $0x1e0] sm:$0xff] }
 0x155   : > { %899 = vmatprep.mubr.f32.mxu1 %v630_v19  ;;  %1060 = vmatprep.mubr.f32.mxu0 %v632_v31  ;;  %v562_v17 = vmul.f32 %v1676_v16, %v1642_v1  ;;  %v559_v23 = vmul.f32 %v1677_v21, %v1642_v1  ;;  %v561_v25 = vmul.f32 %v1678_v24, %v1642_v1 }
 0x156   : > { %v641_v14 = vmul.f32 %v2544_v43, %v555_v20  ;;  %v643_v22 = vmul.f32 %v2546_v45, %v557_v12  ;;  %v646_v19 = vmul.f32 %v2540_v42, %v560_v11 }
 0x157   : > { %v1644_v10 = vpop.eup %1643  ;;  %v648_v27 = vmul.f32 %v2542_v38, %v562_v17  ;;  %v645_v34 = vmul.f32 %v2544_v43, %v559_v23  ;;  %v647_v29 = vmul.f32 %v2546_v45, %v561_v25 }
 0x158   : > { %900 = vmatmul.mubr.f32.gmra.mrb[14].mxu1 %v629_v37  ;;  %1061 = vmatmul.mubr.f32.gmra.mrb[14].mxu0 %v631_v39  ;;  %v1646_v13 = vpop.eup %1645  ;;  %v564_v31 = vmul.f32 %v1679_v30, %v1644_v10  ;;  %v566_v32 = vmul.f32 %v1680_v26, %v1644_v10  ;;  %v1681_v37 = vld [vmem:[%s2251_s7 + $0x180] sm:$0xff]  ;;  %v565_v28 = vmul.f32 %v1682_v41, %v1644_v10 }
 0x159   : > { %905 = vmatprep.mubr.f32.mxu1 %v634_v52  ;;  %1066 = vmatprep.mubr.f32.mxu0 %v636_v53  ;;  %v563_v39 = vmul.f32 %v1681_v37, %v1644_v10  ;;  %v568_v36 = vmul.f32 %v1683_v33, %v1646_v13  ;;  %v570_v40 = vmul.f32 %v1684_v35, %v1646_v13  ;;  %v1686_v53 = vld [vmem:[%s2251_s7 + $0x1b0] sm:$0xff] }
 0x15a   : > { %v650_v44 = vmul.f32 %v2540_v42, %v564_v31  ;;  %v652_v48 = vmul.f32 %v2542_v38, %v566_v32  ;;  %v1648_v46 = vpop.eup %1647  ;;  %v567_v52 = vmul.f32 %v1685_v51, %v1646_v13  ;;  %v569_v54 = vmul.f32 %v1686_v53, %v1646_v13 }
 0x15b   : > { %v649_v56 = vmul.f32 %v2544_v43, %v563_v39  ;;  %v651_v47 = vmul.f32 %v2546_v45, %v565_v28  ;;  %v654_v59 = vmul.f32 %v2540_v42, %v568_v36  ;;  %v1650_v50 = vpop.eup %1649  ;;  %v656_v57 = vmul.f32 %v2542_v38, %v570_v40 }
 0x15c   : > { %906 = vmatmul.mubr.f32.gmra.mrb[16].mxu1 %v633_v49  ;;  %1067 = vmatmul.mubr.f32.gmra.mrb[16].mxu0 %v635_v58  ;;  %v572_v49 = vmul.f32 %v1687_v55, %v1648_v46  ;;  %v1688_v58 = vld [vmem:[%s2251_s7 + $0x1d8] sm:$0xff]  ;;  %v653_v61 = vmul.f32 %v2544_v43, %v567_v52  ;;  %v655_v1 = vmul.f32 %v2546_v45, %v569_v54 }
 0x15d   : > { %911 = vmatprep.mubr.f32.mxu1 %v638_v60  ;;  %1072 = vmatprep.mubr.f32.mxu0 %v640_v3  ;;  %v574_v60 = vmul.f32 %v1688_v58, %v1648_v46  ;;  %v1689_v3 = vld [vmem:[%s2251_s7 + $0x1c0] sm:$0xff]  ;;  %v573_v62 = vmul.f32 %v1690_v2, %v1648_v46  ;;  %v578_v20 = vmul.f32 %v1692_v18, %v1650_v50 }
 0x15e   : > { %v571_v0 = vmul.f32 %v1689_v3, %v1648_v46  ;;  %v575_v12 = vmul.f32 %v1693_v9, %v1650_v50 }
 0x15f   : > { %v660_v6 = vmul.f32 %v2542_v38, %v574_v60  ;;  %v659_v11 = vmul.f32 %v2546_v45, %v573_v62  ;;  %v664_v17 = vmul.f32 %v2542_v38, %v578_v20 }
 0x160   : > { %912 = vmatmul.mubr.f32.gmra.mrb[18].mxu1 %v637_v4  ;;  %1073 = vmatmul.mubr.f32.gmra.mrb[18].mxu0 %v639_v5  ;;  %v576_v4 = vmul.f32 %v1691_v63, %v1650_v50  ;;  %v658_v5 = vmul.f32 %v2540_v42, %v572_v49  ;;  %v657_v8 = vmul.f32 %v2544_v43, %v571_v0 }
 0x161   : > { %917 = vmatprep.mubr.f32.mxu1 %v642_v7  ;;  %1078 = vmatprep.mubr.f32.mxu0 %v644_v15  ;;  %v1694_v7 = vld [vmem:[%s2251_s7 + $0x1f0] sm:$0xff]  ;;  %v661_v10 = vmul.f32 %v2544_v43, %v575_v12  ;;  %s1947_s7 = smov [#allocation8]  }
 0x162   : > { %v577_v15 = vmul.f32 %v1694_v7, %v1650_v50  ;;  %v662_v16 = vmul.f32 %v2540_v42, %v576_v4  ;;  %s1787_s10 = sshll.u32 %s1947_s7, 4  ;;  %s1788_s10 = int_to_ptr.vmem [resolvable:$false] %s1787_s10 }
 0x163   : > { %s1789_s28 = scalar_lea.vmem %s1788_s10, 8192  ;;  %p1790_p0 = scmp.lt.s32.totalorder %s2719_s6, %s1788_s10 }
 0x164   : > { %918 = vmatmul.mubr.f32.gmra.mrb[20].mxu1 %v641_v14  ;;  %1079 = vmatmul.mubr.f32.gmra.mrb[20].mxu0 %v643_v22  ;;  %v663_v21 = vmul.f32 %v2546_v45, %v577_v15  ;;  %p1791_p5 = scmp.lt.s32.totalorder %s1789_s28, %s1783_s30 }
 0x165   : > { %923 = vmatprep.mubr.f32.mxu1 %v646_v19  ;;  %1084 = vmatprep.mubr.f32.mxu0 %v648_v27 }
 0x166   : > { %p1792_p12 = por %p1791_p5, %p1790_p0 }
 0x168   : > { %924 = vmatmul.mubr.f32.gmra.mrb[22].mxu1 %v645_v34  ;;  %1085 = vmatmul.mubr.f32.gmra.mrb[22].mxu0 %v647_v29  ;;  %p1793_p13 = pnand %p1792_p12, %p1786_p8 }
 0x169   : > { %929 = vmatprep.mubr.f32.mxu1 %v650_v44  ;;  %1090 = vmatprep.mubr.f32.mxu0 %v652_v48 }
 0x16c   : > { %930 = vmatmul.mubr.f32.gmra.mrb[24].mxu1 %v649_v56  ;;  %1091 = vmatmul.mubr.f32.gmra.mrb[24].mxu0 %v651_v47 }
 0x16d   : > { %935 = vmatprep.mubr.f32.mxu1 %v654_v59  ;;  %1096 = vmatprep.mubr.f32.mxu0 %v656_v57 }
 0x170   : > { %936 = vmatmul.mubr.f32.gmra.mrb[26].mxu1 %v653_v61  ;;  %1097 = vmatmul.mubr.f32.gmra.mrb[26].mxu0 %v655_v1 }
 0x171   : > { %941 = vmatprep.mubr.f32.mxu1 %v658_v5  ;;  %1102 = vmatprep.mubr.f32.mxu0 %v660_v6 }
 0x174   : > { %942 = vmatmul.mubr.f32.gmra.mrb[28].mxu1 %v657_v8  ;;  %1103 = vmatmul.mubr.f32.gmra.mrb[28].mxu0 %v659_v11 }
 0x175   : > { %947 = vmatprep.mubr.f32.mxu1 %v662_v16  ;;  %1108 = vmatprep.mubr.f32.mxu0 %v664_v17 }
 0x178   : > { %948 = vmatmul.mubr.f32.gmra.mrb[30].mxu1 %v661_v10  ;;  %1109 = vmatmul.mubr.f32.gmra.mrb[30].mxu0 %v663_v21 }
 0x20f   : > { %v859_v23 = vpop.f32.mrb[0].mxu1  ;;  %v1020_v24 = vpop.f32.mrb[0].mxu0 }
 0x210   : > { %v1021_v25 = vadd.f32 %v1020_v24, %v859_v23  ;;  %v861_v14 = vpop.f32.mrb[1].mxu1  ;;  %v1022_v42 = vpop.f32.mrb[1].mxu0 }
 0x211   : > { %v1023_v22 = vadd.f32 %v1022_v42, %v861_v14 }
 0x212   : > { %1115 = vst [vmem:[%s2679_s18] sm:$0xff] %v1021_v25 }
 0x213   : > { %1116 = vst [vmem:[%s2679_s18 + $0x8] sm:$0xff] %v1023_v22  ;;  %v865_v38 = vpop.f32.mrb[2].mxu1  ;;  %v1026_v43 = vpop.f32.mrb[2].mxu0 }
 0x214   : > { %v1027_v45 = vadd.f32 %v1026_v43, %v865_v38  ;;  %v867_v19 = vpop.f32.mrb[3].mxu1  ;;  %v1028_v13 = vpop.f32.mrb[3].mxu0 }
 0x215   : > { %v1029_v27 = vadd.f32 %v1028_v13, %v867_v19 }
 0x216   : > { %1117 = vst [vmem:[%s2679_s18 + $0x10] sm:$0xff] %v1027_v45 }
 0x217   : > { %1118 = vst [vmem:[%s2679_s18 + $0x18] sm:$0xff] %v1029_v27  ;;  %v871_v30 = vpop.f32.mrb[4].mxu1  ;;  %v1032_v31 = vpop.f32.mrb[4].mxu0 }
 0x218   : > { %v1033_v26 = vadd.f32 %v1032_v31, %v871_v30  ;;  %v873_v32 = vpop.f32.mrb[5].mxu1  ;;  %v1034_v34 = vpop.f32.mrb[5].mxu0 }
 0x219   : > { %v1035_v29 = vadd.f32 %v1034_v34, %v873_v32 }
 0x21a   : > { %1119 = vst [vmem:[%s2679_s18 + $0x20] sm:$0xff] %v1033_v26 }
 0x21b   : > { %1120 = vst [vmem:[%s2679_s18 + $0x28] sm:$0xff] %v1035_v29  ;;  %v877_v37 = vpop.f32.mrb[6].mxu1  ;;  %v1038_v39 = vpop.f32.mrb[6].mxu0 }
 0x21c   : > { %v1039_v41 = vadd.f32 %v1038_v39, %v877_v37  ;;  %v879_v28 = vpop.f32.mrb[7].mxu1  ;;  %v1040_v33 = vpop.f32.mrb[7].mxu0 }
 0x21d   : > { %v1041_v36 = vadd.f32 %v1040_v33, %v879_v28 }
 0x21e   : > { %1121 = vst [vmem:[%s2679_s18 + $0x30] sm:$0xff] %v1039_v41 }
 0x21f   : > { %1122 = vst [vmem:[%s2679_s18 + $0x38] sm:$0xff] %v1041_v36  ;;  %v883_v44 = vpop.f32.mrb[8].mxu1  ;;  %v1044_v48 = vpop.f32.mrb[8].mxu0 }
 0x220   : > { %v1045_v35 = vadd.f32 %v1044_v48, %v883_v44  ;;  %v885_v40 = vpop.f32.mrb[9].mxu1  ;;  %v1046_v46 = vpop.f32.mrb[9].mxu0 }
 0x221   : > { %v1047_v51 = vadd.f32 %v1046_v46, %v885_v40 }
 0x222   : > { %1123 = vst [vmem:[%s2679_s18 + $0x40] sm:$0xff] %v1045_v35 }
 0x223   : > { %1124 = vst [vmem:[%s2679_s18 + $0x48] sm:$0xff] %v1047_v51  ;;  %v889_v52 = vpop.f32.mrb[10].mxu1  ;;  %v1050_v53 = vpop.f32.mrb[10].mxu0 }
 0x224   : > { %v1051_v54 = vadd.f32 %v1050_v53, %v889_v52  ;;  %v891_v56 = vpop.f32.mrb[11].mxu1  ;;  %v1052_v47 = vpop.f32.mrb[11].mxu0 }
 0x225   : > { %v1053_v59 = vadd.f32 %v1052_v47, %v891_v56 }
 0x226   : > { %1125 = vst [vmem:[%s2679_s18 + $0x50] sm:$0xff] %v1051_v54 }
 0x227   : > { %1126 = vst [vmem:[%s2679_s18 + $0x58] sm:$0xff] %v1053_v59  ;;  %v895_v50 = vpop.f32.mrb[12].mxu1  ;;  %v1056_v57 = vpop.f32.mrb[12].mxu0 }
 0x228   : > { %v1057_v55 = vadd.f32 %v1056_v57, %v895_v50  ;;  %v897_v49 = vpop.f32.mrb[13].mxu1  ;;  %v1058_v58 = vpop.f32.mrb[13].mxu0 }
 0x229   : > { %v1059_v60 = vadd.f32 %v1058_v58, %v897_v49 }
 0x22a   : > { %1127 = vst [vmem:[%s2679_s18 + $0x60] sm:$0xff] %v1057_v55 }
 0x22b   : > { %1128 = vst [vmem:[%s2679_s18 + $0x68] sm:$0xff] %v1059_v60  ;;  %v901_v61 = vpop.f32.mrb[14].mxu1  ;;  %v1062_v1 = vpop.f32.mrb[14].mxu0 }
 0x22c   : > { %v1063_v3 = vadd.f32 %v1062_v1, %v901_v61  ;;  %v903_v0 = vpop.f32.mrb[15].mxu1  ;;  %v1064_v2 = vpop.f32.mrb[15].mxu0 }
 0x22d   : > { %v1065_v62 = vadd.f32 %v1064_v2, %v903_v0 }
 0x22e   : > { %1129 = vst [vmem:[%s2679_s18 + $0x70] sm:$0xff] %v1063_v3 }
 0x22f   : > { %1130 = vst [vmem:[%s2679_s18 + $0x78] sm:$0xff] %v1065_v62  ;;  %v907_v63 = vpop.f32.mrb[16].mxu1  ;;  %v1068_v4 = vpop.f32.mrb[16].mxu0 }
 0x230   : > { %v1069_v5 = vadd.f32 %v1068_v4, %v907_v63  ;;  %v909_v6 = vpop.f32.mrb[17].mxu1  ;;  %v1070_v18 = vpop.f32.mrb[17].mxu0 }
 0x231   : > { %v1071_v20 = vadd.f32 %v1070_v18, %v909_v6 }
 0x232   : > { %1131 = vst [vmem:[%s2679_s18 + $0x80] sm:$0xff] %v1069_v5 }
 0x233   : > { %1132 = vst [vmem:[%s2679_s18 + $0x88] sm:$0xff] %v1071_v20  ;;  %v913_v9 = vpop.f32.mrb[18].mxu1  ;;  %v1074_v12 = vpop.f32.mrb[18].mxu0 }
 0x234   : > { %v1075_v8 = vadd.f32 %v1074_v12, %v913_v9  ;;  %v915_v11 = vpop.f32.mrb[19].mxu1  ;;  %v1076_v7 = vpop.f32.mrb[19].mxu0 }
 0x235   : > { %v1077_v15 = vadd.f32 %v1076_v7, %v915_v11 }
 0x236   : > { %1133 = vst [vmem:[%s2679_s18 + $0x90] sm:$0xff] %v1075_v8 }
 0x237   : > { %1134 = vst [vmem:[%s2679_s18 + $0x98] sm:$0xff] %v1077_v15  ;;  %v919_v16 = vpop.f32.mrb[20].mxu1  ;;  %v1080_v17 = vpop.f32.mrb[20].mxu0 }
 0x238   : > { %v1081_v10 = vadd.f32 %v1080_v17, %v919_v16  ;;  %v921_v21 = vpop.f32.mrb[21].mxu1  ;;  %v1082_v23 = vpop.f32.mrb[21].mxu0 }
 0x239   : > { %v1083_v24 = vadd.f32 %v1082_v23, %v921_v21 }
 0x23a   : > { %1135 = vst [vmem:[%s2679_s18 + $0xa0] sm:$0xff] %v1081_v10 }
 0x23b   : > { %1136 = vst [vmem:[%s2679_s18 + $0xa8] sm:$0xff] %v1083_v24  ;;  %v925_v25 = vpop.f32.mrb[22].mxu1  ;;  %v1086_v14 = vpop.f32.mrb[22].mxu0 }
 0x23c   : > { %v1087_v42 = vadd.f32 %v1086_v14, %v925_v25  ;;  %v927_v22 = vpop.f32.mrb[23].mxu1  ;;  %v1088_v38 = vpop.f32.mrb[23].mxu0 }
 0x23d   : > { %v1089_v43 = vadd.f32 %v1088_v38, %v927_v22 }
 0x23e   : > { %1137 = vst [vmem:[%s2679_s18 + $0xb0] sm:$0xff] %v1087_v42 }
 0x23f   : > { %1138 = vst [vmem:[%s2679_s18 + $0xb8] sm:$0xff] %v1089_v43  ;;  %v931_v45 = vpop.f32.mrb[24].mxu1  ;;  %v1092_v19 = vpop.f32.mrb[24].mxu0 }
 0x240   : > { %v1093_v13 = vadd.f32 %v1092_v19, %v931_v45  ;;  %v933_v27 = vpop.f32.mrb[25].mxu1  ;;  %v1094_v30 = vpop.f32.mrb[25].mxu0 }
 0x241   : > { %v1095_v31 = vadd.f32 %v1094_v30, %v933_v27 }
 0x242   : > { %1139 = vst [vmem:[%s2679_s18 + $0xc0] sm:$0xff] %v1093_v13 }
 0x243   : > { %1140 = vst [vmem:[%s2679_s18 + $0xc8] sm:$0xff] %v1095_v31  ;;  %v937_v26 = vpop.f32.mrb[26].mxu1  ;;  %v1098_v32 = vpop.f32.mrb[26].mxu0 }
 0x244   : > { %v1099_v34 = vadd.f32 %v1098_v32, %v937_v26  ;;  %v939_v29 = vpop.f32.mrb[27].mxu1  ;;  %v1100_v37 = vpop.f32.mrb[27].mxu0 }
 0x245   : > { %v1101_v39 = vadd.f32 %v1100_v37, %v939_v29 }
 0x246   : > { %1141 = vst [vmem:[%s2679_s18 + $0xd0] sm:$0xff] %v1099_v34 }
 0x247   : > { %1142 = vst [vmem:[%s2679_s18 + $0xd8] sm:$0xff] %v1101_v39  ;;  %v943_v41 = vpop.f32.mrb[28].mxu1  ;;  %v1104_v28 = vpop.f32.mrb[28].mxu0 }
 0x248   : > { %v1105_v33 = vadd.f32 %v1104_v28, %v943_v41  ;;  %v945_v36 = vpop.f32.mrb[29].mxu1  ;;  %v1106_v44 = vpop.f32.mrb[29].mxu0 }
 0x249   : > { %v1107_v48 = vadd.f32 %v1106_v44, %v945_v36 }
 0x24a   : > { %1143 = vst [vmem:[%s2679_s18 + $0xe0] sm:$0xff] %v1105_v33 }
 0x24b   : > { %1144 = vst [vmem:[%s2679_s18 + $0xe8] sm:$0xff] %v1107_v48  ;;  %v949_v35 = vpop.f32.mrb[30].mxu1  ;;  %v1110_v40 = vpop.f32.mrb[30].mxu0 }
 0x24c   : > { %v1111_v46 = vadd.f32 %v1110_v40, %v949_v35  ;;  %v951_v51 = vpop.f32.mrb[31].mxu1  ;;  %v1112_v52 = vpop.f32.mrb[31].mxu0 }
 0x24d   : > { %v1113_v53 = vadd.f32 %v1112_v52, %v951_v51 }
 0x24e   : > { %1145 = vst [vmem:[%s2679_s18 + $0xf0] sm:$0xff] %v1111_v46 }
 0x24f   : > { %1146 = vst [vmem:[%s2679_s18 + $0xf8] sm:$0xff] %v1113_v53 }
 0x250   : > { %1796 = shalt.err (!%p1793_p13)
}
 0x251   : > { %s1797_s11 = scalar_lea.hbm %s2717_s23, 4096  ;;  %s1801_s18 = scalar_lea.hbm %s2857_s4, 49152 }
 0x252   : > { %p1798_p10 = scmp.ne.s32.totalorder %s2717_s23, %s1797_s11  ;;  %p1802_p3 = scmp.lt.u32.totalorder %s2717_s23, %s2857_s4 }
 0x253   : > { %p1803_p4 = scmp.lt.u32.totalorder %s1801_s18, %s1797_s11  ;;  %p1805_p2 = scmp.lt.u32.totalorder %s1797_s11, %s2717_s23 }
 0x254   : > { %p1799_p11 = pnand %p1798_p10, %p2858_p6 }
 0x255   : > { %p1804_p7 = por %p1803_p4, %p1802_p3 }
 0x256   : > { %p1800_p1 = pneg %p1799_p11 }
 0x257   : > { %p1806_p9 = por %p1805_p2, %p1804_p7 }
 0x259   : > { %p1807_p8 = pnand %p1806_p9, %p1800_p1 }
 0x25b   : > { %1810 = shalt.err (!%p1807_p8)
}
 0x25c   : > { %s1948_s22 = smov 256   ;;  %s1949_s26 = smov 1536  }
 0x25d   : > { %s1950_s5 = smov 16  }
 0x25e   : > { %1477 = dma.vmem_to_hbm [thread:$0]  (%p2858_p6), %s2719_s6, 4096, %s2717_s23, %s2725_s24, %s1948_s22, %s1949_s26, %s1950_s5  }
 0x25f PF: > { %p1497_p0 = scmp.ge.s32.totalorder %s1937_s25, 2  ;;  %s1179_s27 = sand.u32 1, %s1885_s12  }
 0x260   : > { %p2859_p5 = scmp.ne.s32.totalorder %s2843_s9, 0  ;;  %s1180_s0 = scalar_lea.sflag [#allocation4], %s1179_s27 }
 0x262   : > { %p1491_p12 = pnand %p1497_p0, %p2859_p5 }
 0x264   : > { %1880 = dma.done.wait (!%p1491_p12), %s1180_s0, 4096  }
 0x265   : > { %1882 = vsyncadd (!%p1491_p12), %s1180_s0, 4294963200  ;;  %s20_s25 = sadd.s32 1, %s1937_s25   ;;  %s2861_s15 = sld [smem:[#allocation23_spill]] }
 0x266   : > { %p2754_p13 = scmp.ge.s32.totalorder %s20_s25, 14   ;;  %s2862_s6 = sld [smem:[#allocation13_spill]] }
 0x267   : > { %s2863_s20 = sld [smem:[#allocation22_spill]]  ;;  %s2864_s23 = sld [smem:[#allocation14_spill]] }
 0x268   : > { %s2865_s24 = sld [smem:[#allocation21_spill]]  ;;  %s2866_s21 = sld [smem:[#allocation17_spill]] }
 0x269   : > { %s2867_s22 = sld [smem:[#allocation18_spill]]  ;;  %s2868_s9 = sld [smem:[#allocation19_spill]] }
 0x26a   : > { %s2869_s30 = sld [smem:[#allocation20_spill]]  ;;  %s2871_s12 = smov %s1889_s13 }
 0x26b   : > { %s2872_s13 = smov %s1893_s14  ;;  %s2873_s14 = smov %s2861_s15 }
 0x26c   : > { %s2874_s15 = smov %s1901_s16  ;;  %s2875_s16 = smov %s2862_s6 }
 0x26d   : > { %s2876_s17 = smov %s2863_s20  ;;  %s2877_s18 = smov %s1913_s19 }
 0x26e   : > { %s2878_s19 = smov %s2864_s23  ;;  %s2879_s20 = smov %s2865_s24 }
 0x26f   : > { %s2880_s23 = smov %s2868_s9  ;;  %19 = sbr.rel (!%p2754_p13) target bundleno = 14 (0xe), region = 92 }
 0x270   : > { %s2881_s24 = smov %s2869_s30 }
 0x276   :  { %1185 = vsyncpa [#allocation3], 1 }
 0x277   :  { %1187 = vsyncpa [#allocation3 + $0x1], 1 }
 0x278   :  { %1188 = vsyncpa [#allocation6], 1 }
 0x279   :  { %1189 = vsyncpa [#allocation4], 1 }
 0x27a   :  { %1191 = vsyncpa [#allocation4 + $0x1], 1 }

</bundles_post_ra>
